<compile_context>
chip_gen: v7x
topology: tpu7x:2x2x1
jax: 0.10.0
libtpu: 0.0.40
codegen_flags: <defaults>
</compile_context>

<pallas_src>
import jax
import jax.numpy as jnp
from jax import lax
from jax.experimental import pallas as pl
from jax.experimental.pallas import tpu as pltpu
import numpy as np

EPS = 1e-8


def lstm_vae_kernel(x_ref, wih_e_ref, whh_e_ref, b_e_ref,
                    whead_ref, bhead_ref,
                    wih_d_ref, whh_d_ref, b_d_ref,
                    dec_ref, head_ref):
    S, Din = x_ref.shape
    H = whh_e_ref.shape[0]
    Z = head_ref.shape[1] // 2

    # Load weights once; reused every unrolled step.
    whh_e = whh_e_ref[...]                                               # (H, 4H)
    whh_d = whh_d_ref[...]                                               # (Din, 4Din)
    wih_d = wih_d_ref[...]                                               # (Z, 4Din)
    whead = whead_ref[...]                                               # (H, 2Z)
    bhead = bhead_ref[...]                                               # (1, 2Z)
    b_d = b_d_ref[...]                                                   # (1, 4Din)

    # Batched encoder input projection (one MXU matmul, off the recurrence chain).
    xg = jnp.dot(x_ref[...], wih_e_ref[...],
                 preferred_element_type=jnp.float32) + b_e_ref[...]      # (S, 4H)

    def lstm_step(gates, c, hsize):
        # Gate columns were permuted host-side to (i, f, o, g):
        #   sigmoid over the contiguous i|f|o block (3*hsize lanes, 1 EUP push),
        #   tanh only over g (hsize lanes, 1 EUP push).
        sg = jax.nn.sigmoid(gates[:, :3 * hsize])
        g = jnp.tanh(gates[:, 3 * hsize:])
        i = sg[:, 0 * hsize:1 * hsize]
        f = sg[:, 1 * hsize:2 * hsize]
        o = sg[:, 2 * hsize:3 * hsize]
        c = f * c + i * g
        h = o * jnp.tanh(c)
        return h, c

    h_e = jnp.zeros((1, H), jnp.float32)
    c_e = jnp.zeros((1, H), jnp.float32)
    h_d = jnp.zeros((1, Din), jnp.float32)
    c_d = jnp.zeros((1, Din), jnp.float32)

    head_rows = []
    dec_rows = []
    # Fully unrolled, interleaved recurrence: decoder step t depends only on
    # encoder step t (via the per-row head + reparameterization), so the two
    # latency chains overlap inside this single basic block.
    for t in range(S):
        # ---- encoder step t ----
        gates_e = xg[t:t + 1, :] + jnp.dot(h_e, whh_e,
                                           preferred_element_type=jnp.float32)
        h_e, c_e = lstm_step(gates_e, c_e, H)

        # ---- fused mu|logvar head, row t: ReLU(Linear) ----
        head_t = jnp.maximum(
            jnp.dot(h_e, whead, preferred_element_type=jnp.float32) + bhead, 0.0)
        head_rows.append(head_t)                                         # (1, 2Z)

        # ---- reparameterize row t ----
        z_t = head_t[:, :Z] + EPS * jnp.exp(0.5 * head_t[:, Z:])         # (1, Z)

        # ---- decoder step t ----
        gates_d = (jnp.dot(z_t, wih_d, preferred_element_type=jnp.float32) + b_d
                   + jnp.dot(h_d, whh_d, preferred_element_type=jnp.float32))
        h_d, c_d = lstm_step(gates_d, c_d, Din)
        dec_rows.append(h_d)                                             # (1, Din)

    # Two lane-dense writebacks (no per-step masked 1-row stores).
    head_ref[...] = jnp.concatenate(head_rows, axis=0)                   # (S, 2Z)
    dec_ref[...] = jnp.concatenate(dec_rows, axis=0)                     # (S, Din)


def _permute_gates(w, hsize):
    """Reorder last-dim gate blocks from PyTorch (i,f,g,o) to kernel (i,f,o,g)."""
    i = w[..., 0 * hsize:1 * hsize]
    f = w[..., 1 * hsize:2 * hsize]
    g = w[..., 2 * hsize:3 * hsize]
    o = w[..., 3 * hsize:4 * hsize]
    return jnp.concatenate([i, f, o, g], axis=-1)


def lstm_vae_forward(x_img, params):
    # glue: PyTorch x.view(-1, img_size)
    S = x_img.shape[0]
    Din = int(np.prod(x_img.shape[1:]))
    x = x_img.reshape(S, Din).astype(jnp.float32)

    H = params["whh_e"].shape[0]
    Z = params["wmu"].shape[1]

    # Fuse mu / logvar head weights -> one matmul in the kernel.
    whead = jnp.concatenate([params["wmu"], params["wlv"]], axis=1)      # (H, 2Z)
    bhead = jnp.concatenate([params["bmu"], params["blv"]], axis=1)      # (1, 2Z)

    # Host-side gate-column permutation (i,f,g,o) -> (i,f,o,g) so in-kernel
    # transcendentals split into one contiguous sigmoid and one contiguous tanh.
    wih_e = _permute_gates(params["wih_e"], H)
    whh_e = _permute_gates(params["whh_e"], H)
    b_e = _permute_gates(params["b_e"], H)
    wih_d = _permute_gates(params["wih_d"], Din)
    whh_d = _permute_gates(params["whh_d"], Din)
    b_d = _permute_gates(params["b_d"], Din)

    args = (x, wih_e, whh_e, b_e, whead, bhead, wih_d, whh_d, b_d)

    def vmem_spec():
        return pl.BlockSpec(memory_space=pltpu.MemorySpace.VMEM)

    # Single-shot kernel: no grid, whole arrays resident in VMEM.
    dec, head = pl.pallas_call(
        lstm_vae_kernel,
        out_shape=(jax.ShapeDtypeStruct((S, Din), jnp.float32),
                   jax.ShapeDtypeStruct((S, 2 * Z), jnp.float32)),
        in_specs=[vmem_spec() for _ in args],
        out_specs=(vmem_spec(), vmem_spec()),
    )(*args)

    # Free XLA slices on HBM (kept out of the kernel per perf review).
    mu = head[:, :Z]
    lv = head[:, Z:]
    return dec, mu, lv


# ---------------- pure-JAX reference for validation ----------------
def reference_forward(x_img, params):
    S = x_img.shape[0]
    Din = int(np.prod(x_img.shape[1:]))
    x = x_img.reshape(S, Din).astype(jnp.float32)

    def run_lstm(seq, wih, whh, b, hsize):
        def step(carry, xt):
            h, c = carry
            gates = xt @ wih + h @ whh + b[0]
            i = jax.nn.sigmoid(gates[0 * hsize:1 * hsize])
            f = jax.nn.sigmoid(gates[1 * hsize:2 * hsize])
            g = jnp.tanh(gates[2 * hsize:3 * hsize])
            o = jax.nn.sigmoid(gates[3 * hsize:4 * hsize])
            c = f * c + i * g
            h = o * jnp.tanh(c)
            return (h, c), h
        init = (jnp.zeros((hsize,), jnp.float32), jnp.zeros((hsize,), jnp.float32))
        _, out = lax.scan(step, init, seq)
        return out

    H = params["whh_e"].shape[0]
    enc = run_lstm(x, params["wih_e"], params["whh_e"], params["b_e"], H)
    mu = jnp.maximum(enc @ params["wmu"] + params["bmu"][0], 0.0)
    lv = jnp.maximum(enc @ params["wlv"] + params["blv"][0], 0.0)
    z = mu + EPS * jnp.exp(0.5 * lv)
    dec = run_lstm(z, params["wih_d"], params["whh_d"], params["b_d"], Din)
    return dec, mu, lv


def init_params(key, img_size, hidden, z_size):
    ks = jax.random.split(key, 11)
    u = lambda k, shape, scale: jax.random.uniform(
        k, shape, jnp.float32, minval=-scale, maxval=scale)
    s_h = 1.0 / np.sqrt(hidden)
    s_d = 1.0 / np.sqrt(img_size)
    return {
        # encoder LSTM (PyTorch weight_ih/weight_hh, stored transposed; biases combined)
        "wih_e": u(ks[0], (img_size, 4 * hidden), s_h),
        "whh_e": u(ks[1], (hidden, 4 * hidden), s_h),
        "b_e":   u(ks[2], (1, 4 * hidden), s_h),
        # mu / logvar Linear layers (transposed)
        "wmu":   u(ks[3], (hidden, z_size), s_h),
        "bmu":   u(ks[4], (1, z_size), s_h),
        "wlv":   u(ks[5], (hidden, z_size), s_h),
        "blv":   u(ks[6], (1, z_size), s_h),
        # decoder LSTM (input_size=z_size, hidden_size=img_size)
        "wih_d": u(ks[7], (z_size, 4 * img_size), s_d),
        "whh_d": u(ks[8], (img_size, 4 * img_size), s_d),
        "b_d":   u(ks[9], (1, 4 * img_size), s_d),
    }


if __name__ == "__main__":
    WIDTH, HEIGHT = 4, 4
    IMG_SIZE = WIDTH * HEIGHT          # 16
    SEQ = 8
    NUM_UNITS_LSTM = 32
    Z_SIZE = 16                        # small stand-in for z_size=100

    key = jax.random.PRNGKey(0)
    kx, kp = jax.random.split(key)
    x_img = jax.random.normal(kx, (SEQ, WIDTH, HEIGHT), jnp.float32)
    params = init_params(kp, IMG_SIZE, NUM_UNITS_LSTM, Z_SIZE)

    dec, mu, lv = lstm_vae_forward(x_img, params)
    jax.block_until_ready((dec, mu, lv))

    dec_r, mu_r, lv_r = reference_forward(x_img, params)
    np.testing.assert_allclose(np.asarray(dec), np.asarray(dec_r), atol=1e-4, rtol=1e-4)
    np.testing.assert_allclose(np.asarray(mu), np.asarray(mu_r), atol=1e-4, rtol=1e-4)
    np.testing.assert_allclose(np.asarray(lv), np.asarray(lv_r), atol=1e-4, rtol=1e-4)

    print("KERNEL_OK")
</pallas_src>

<mosaic_0001>
module attributes {stable_mosaic.version = 11 : i64} {
  func.func @lstm_vae_kernel(%arg0: memref<8x16xf32, #tpu.memory_space<vmem>>, %arg1: memref<16x128xf32, #tpu.memory_space<vmem>>, %arg2: memref<32x128xf32, #tpu.memory_space<vmem>>, %arg3: memref<1x128xf32, #tpu.memory_space<vmem>>, %arg4: memref<32x32xf32, #tpu.memory_space<vmem>>, %arg5: memref<1x32xf32, #tpu.memory_space<vmem>>, %arg6: memref<16x64xf32, #tpu.memory_space<vmem>>, %arg7: memref<16x64xf32, #tpu.memory_space<vmem>>, %arg8: memref<1x64xf32, #tpu.memory_space<vmem>>, %arg9: memref<8x16xf32, #tpu.memory_space<vmem>>, %arg10: memref<8x32xf32, #tpu.memory_space<vmem>>) attributes {dimension_semantics = [], scalar_prefetch = 0 : i64, scratch_operands = 0 : i64, tpu.core_type = #tpu.core_type<tc>} {
    %c0 = arith.constant 0 : index
    %c0_0 = arith.constant 0 : index
    %0 = vector.load %arg2[%c0, %c0_0] : memref<32x128xf32, #tpu.memory_space<vmem>>, vector<32x128xf32>
    %c0_1 = arith.constant 0 : index
    %c0_2 = arith.constant 0 : index
    %1 = vector.load %arg7[%c0_1, %c0_2] : memref<16x64xf32, #tpu.memory_space<vmem>>, vector<16x64xf32>
    %c0_3 = arith.constant 0 : index
    %c0_4 = arith.constant 0 : index
    %2 = vector.load %arg6[%c0_3, %c0_4] : memref<16x64xf32, #tpu.memory_space<vmem>>, vector<16x64xf32>
    %c0_5 = arith.constant 0 : index
    %c0_6 = arith.constant 0 : index
    %3 = vector.load %arg4[%c0_5, %c0_6] : memref<32x32xf32, #tpu.memory_space<vmem>>, vector<32x32xf32>
    %c0_7 = arith.constant 0 : index
    %c0_8 = arith.constant 0 : index
    %4 = vector.load %arg5[%c0_7, %c0_8] : memref<1x32xf32, #tpu.memory_space<vmem>>, vector<1x32xf32>
    %c0_9 = arith.constant 0 : index
    %c0_10 = arith.constant 0 : index
    %5 = vector.load %arg8[%c0_9, %c0_10] : memref<1x64xf32, #tpu.memory_space<vmem>>, vector<1x64xf32>
    %c0_11 = arith.constant 0 : index
    %c0_12 = arith.constant 0 : index
    %6 = vector.load %arg0[%c0_11, %c0_12] : memref<8x16xf32, #tpu.memory_space<vmem>>, vector<8x16xf32>
    %c0_13 = arith.constant 0 : index
    %c0_14 = arith.constant 0 : index
    %7 = vector.load %arg1[%c0_13, %c0_14] : memref<16x128xf32, #tpu.memory_space<vmem>>, vector<16x128xf32>
    %cst = arith.constant dense<0.000000e+00> : vector<8x128xf32>
    %8 = tpu.matmul %6, %7, %cst {dimension_numbers = #tpu.dot_dimension_numbers<[1], [0], [0], [1], [0, 0, 1, 1], [], []>} : vector<8x16xf32>, vector<16x128xf32>, vector<8x128xf32> -> vector<8x128xf32>
    %c0_15 = arith.constant 0 : index
    %c0_16 = arith.constant 0 : index
    %9 = vector.load %arg3[%c0_15, %c0_16] : memref<1x128xf32, #tpu.memory_space<vmem>>, vector<1x128xf32>
    %10 = vector.broadcast %9 : vector<1x128xf32> to vector<8x128xf32>
    %11 = arith.addf %8, %10 : vector<8x128xf32>
    %cst_17 = arith.constant 0.000000e+00 : f32
    %12 = vector.broadcast %cst_17 : f32 to vector<1x32xf32>
    %cst_18 = arith.constant 0.000000e+00 : f32
    %13 = vector.broadcast %cst_18 : f32 to vector<1x32xf32>
    %cst_19 = arith.constant 0.000000e+00 : f32
    %14 = vector.broadcast %cst_19 : f32 to vector<1x16xf32>
    %cst_20 = arith.constant 0.000000e+00 : f32
    %15 = vector.broadcast %cst_20 : f32 to vector<1x16xf32>
    %16 = vector.extract_strided_slice %11 {offsets = [0, 0], sizes = [1, 128], strides = [1, 1]} : vector<8x128xf32> to vector<1x128xf32>
    %cst_21 = arith.constant dense<0.000000e+00> : vector<1x128xf32>
    %17 = tpu.matmul %12, %0, %cst_21 {dimension_numbers = #tpu.dot_dimension_numbers<[1], [0], [0], [1], [0, 0, 1, 1], [], []>} : vector<1x32xf32>, vector<32x128xf32>, vector<1x128xf32> -> vector<1x128xf32>
    %18 = arith.addf %16, %17 : vector<1x128xf32>
    %19 = vector.extract_strided_slice %18 {offsets = [0, 0], sizes = [1, 96], strides = [1, 1]} : vector<1x128xf32> to vector<1x96xf32>
    %20 = arith.negf %19 : vector<1x96xf32>
    %21 = math.exp %20 : vector<1x96xf32>
    %cst_22 = arith.constant 1.000000e+00 : f32
    %22 = vector.broadcast %cst_22 : f32 to vector<1x96xf32>
    %23 = arith.addf %22, %21 : vector<1x96xf32>
    %24 = arith.divf %22, %23 : vector<1x96xf32>
    %25 = vector.extract_strided_slice %18 {offsets = [0, 96], sizes = [1, 32], strides = [1, 1]} : vector<1x128xf32> to vector<1x32xf32>
    %26 = math.tanh %25 : vector<1x32xf32>
    %27 = vector.extract_strided_slice %24 {offsets = [0, 0], sizes = [1, 32], strides = [1, 1]} : vector<1x96xf32> to vector<1x32xf32>
    %28 = vector.extract_strided_slice %24 {offsets = [0, 32], sizes = [1, 32], strides = [1, 1]} : vector<1x96xf32> to vector<1x32xf32>
    %29 = vector.extract_strided_slice %24 {offsets = [0, 64], sizes = [1, 32], strides = [1, 1]} : vector<1x96xf32> to vector<1x32xf32>
    %30 = arith.mulf %28, %13 : vector<1x32xf32>
    %31 = arith.mulf %27, %26 : vector<1x32xf32>
    %32 = arith.addf %30, %31 : vector<1x32xf32>
    %33 = math.tanh %32 : vector<1x32xf32>
    %34 = arith.mulf %29, %33 : vector<1x32xf32>
    %cst_23 = arith.constant dense<0.000000e+00> : vector<1x32xf32>
    %35 = tpu.matmul %34, %3, %cst_23 {dimension_numbers = #tpu.dot_dimension_numbers<[1], [0], [0], [1], [0, 0, 1, 1], [], []>} : vector<1x32xf32>, vector<32x32xf32>, vector<1x32xf32> -> vector<1x32xf32>
    %36 = arith.addf %35, %4 : vector<1x32xf32>
    %cst_24 = arith.constant 0.000000e+00 : f32
    %37 = vector.broadcast %cst_24 : f32 to vector<1x32xf32>
    %38 = arith.maximumf %36, %37 : vector<1x32xf32>
    %39 = vector.extract_strided_slice %38 {offsets = [0, 0], sizes = [1, 16], strides = [1, 1]} : vector<1x32xf32> to vector<1x16xf32>
    %40 = vector.extract_strided_slice %38 {offsets = [0, 16], sizes = [1, 16], strides = [1, 1]} : vector<1x32xf32> to vector<1x16xf32>
    %cst_25 = arith.constant 5.000000e-01 : f32
    %41 = vector.broadcast %cst_25 : f32 to vector<1x16xf32>
    %42 = arith.mulf %41, %40 : vector<1x16xf32>
    %43 = math.exp %42 : vector<1x16xf32>
    %cst_26 = arith.constant 9.99999993E-9 : f32
    %44 = vector.broadcast %cst_26 : f32 to vector<1x16xf32>
    %45 = arith.mulf %44, %43 : vector<1x16xf32>
    %46 = arith.addf %39, %45 : vector<1x16xf32>
    %cst_27 = arith.constant dense<0.000000e+00> : vector<1x64xf32>
    %47 = tpu.matmul %46, %2, %cst_27 {dimension_numbers = #tpu.dot_dimension_numbers<[1], [0], [0], [1], [0, 0, 1, 1], [], []>} : vector<1x16xf32>, vector<16x64xf32>, vector<1x64xf32> -> vector<1x64xf32>
    %48 = arith.addf %47, %5 : vector<1x64xf32>
    %cst_28 = arith.constant dense<0.000000e+00> : vector<1x64xf32>
    %49 = tpu.matmul %14, %1, %cst_28 {dimension_numbers = #tpu.dot_dimension_numbers<[1], [0], [0], [1], [0, 0, 1, 1], [], []>} : vector<1x16xf32>, vector<16x64xf32>, vector<1x64xf32> -> vector<1x64xf32>
    %50 = arith.addf %48, %49 : vector<1x64xf32>
    %51 = vector.extract_strided_slice %50 {offsets = [0, 0], sizes = [1, 48], strides = [1, 1]} : vector<1x64xf32> to vector<1x48xf32>
    %52 = arith.negf %51 : vector<1x48xf32>
    %53 = math.exp %52 : vector<1x48xf32>
    %cst_29 = arith.constant 1.000000e+00 : f32
    %54 = vector.broadcast %cst_29 : f32 to vector<1x48xf32>
    %55 = arith.addf %54, %53 : vector<1x48xf32>
    %56 = arith.divf %54, %55 : vector<1x48xf32>
    %57 = vector.extract_strided_slice %50 {offsets = [0, 48], sizes = [1, 16], strides = [1, 1]} : vector<1x64xf32> to vector<1x16xf32>
    %58 = math.tanh %57 : vector<1x16xf32>
    %59 = vector.extract_strided_slice %56 {offsets = [0, 0], sizes = [1, 16], strides = [1, 1]} : vector<1x48xf32> to vector<1x16xf32>
    %60 = vector.extract_strided_slice %56 {offsets = [0, 16], sizes = [1, 16], strides = [1, 1]} : vector<1x48xf32> to vector<1x16xf32>
    %61 = vector.extract_strided_slice %56 {offsets = [0, 32], sizes = [1, 16], strides = [1, 1]} : vector<1x48xf32> to vector<1x16xf32>
    %62 = arith.mulf %60, %15 : vector<1x16xf32>
    %63 = arith.mulf %59, %58 : vector<1x16xf32>
    %64 = arith.addf %62, %63 : vector<1x16xf32>
    %65 = math.tanh %64 : vector<1x16xf32>
    %66 = arith.mulf %61, %65 : vector<1x16xf32>
    %67 = vector.extract_strided_slice %11 {offsets = [1, 0], sizes = [1, 128], strides = [1, 1]} : vector<8x128xf32> to vector<1x128xf32>
    %cst_30 = arith.constant dense<0.000000e+00> : vector<1x128xf32>
    %68 = tpu.matmul %34, %0, %cst_30 {dimension_numbers = #tpu.dot_dimension_numbers<[1], [0], [0], [1], [0, 0, 1, 1], [], []>} : vector<1x32xf32>, vector<32x128xf32>, vector<1x128xf32> -> vector<1x128xf32>
    %69 = arith.addf %67, %68 : vector<1x128xf32>
    %70 = vector.extract_strided_slice %69 {offsets = [0, 0], sizes = [1, 96], strides = [1, 1]} : vector<1x128xf32> to vector<1x96xf32>
    %71 = arith.negf %70 : vector<1x96xf32>
    %72 = math.exp %71 : vector<1x96xf32>
    %cst_31 = arith.constant 1.000000e+00 : f32
    %73 = vector.broadcast %cst_31 : f32 to vector<1x96xf32>
    %74 = arith.addf %73, %72 : vector<1x96xf32>
    %75 = arith.divf %73, %74 : vector<1x96xf32>
    %76 = vector.extract_strided_slice %69 {offsets = [0, 96], sizes = [1, 32], strides = [1, 1]} : vector<1x128xf32> to vector<1x32xf32>
    %77 = math.tanh %76 : vector<1x32xf32>
    %78 = vector.extract_strided_slice %75 {offsets = [0, 0], sizes = [1, 32], strides = [1, 1]} : vector<1x96xf32> to vector<1x32xf32>
    %79 = vector.extract_strided_slice %75 {offsets = [0, 32], sizes = [1, 32], strides = [1, 1]} : vector<1x96xf32> to vector<1x32xf32>
    %80 = vector.extract_strided_slice %75 {offsets = [0, 64], sizes = [1, 32], strides = [1, 1]} : vector<1x96xf32> to vector<1x32xf32>
    %81 = arith.mulf %79, %32 : vector<1x32xf32>
    %82 = arith.mulf %78, %77 : vector<1x32xf32>
    %83 = arith.addf %81, %82 : vector<1x32xf32>
    %84 = math.tanh %83 : vector<1x32xf32>
    %85 = arith.mulf %80, %84 : vector<1x32xf32>
    %cst_32 = arith.constant dense<0.000000e+00> : vector<1x32xf32>
    %86 = tpu.matmul %85, %3, %cst_32 {dimension_numbers = #tpu.dot_dimension_numbers<[1], [0], [0], [1], [0, 0, 1, 1], [], []>} : vector<1x32xf32>, vector<32x32xf32>, vector<1x32xf32> -> vector<1x32xf32>
    %87 = arith.addf %86, %4 : vector<1x32xf32>
    %cst_33 = arith.constant 0.000000e+00 : f32
    %88 = vector.broadcast %cst_33 : f32 to vector<1x32xf32>
    %89 = arith.maximumf %87, %88 : vector<1x32xf32>
    %90 = vector.extract_strided_slice %89 {offsets = [0, 0], sizes = [1, 16], strides = [1, 1]} : vector<1x32xf32> to vector<1x16xf32>
    %91 = vector.extract_strided_slice %89 {offsets = [0, 16], sizes = [1, 16], strides = [1, 1]} : vector<1x32xf32> to vector<1x16xf32>
    %cst_34 = arith.constant 5.000000e-01 : f32
    %92 = vector.broadcast %cst_34 : f32 to vector<1x16xf32>
    %93 = arith.mulf %92, %91 : vector<1x16xf32>
    %94 = math.exp %93 : vector<1x16xf32>
    %cst_35 = arith.constant 9.99999993E-9 : f32
    %95 = vector.broadcast %cst_35 : f32 to vector<1x16xf32>
    %96 = arith.mulf %95, %94 : vector<1x16xf32>
    %97 = arith.addf %90, %96 : vector<1x16xf32>
    %cst_36 = arith.constant dense<0.000000e+00> : vector<1x64xf32>
    %98 = tpu.matmul %97, %2, %cst_36 {dimension_numbers = #tpu.dot_dimension_numbers<[1], [0], [0], [1], [0, 0, 1, 1], [], []>} : vector<1x16xf32>, vector<16x64xf32>, vector<1x64xf32> -> vector<1x64xf32>
    %99 = arith.addf %98, %5 : vector<1x64xf32>
    %cst_37 = arith.constant dense<0.000000e+00> : vector<1x64xf32>
    %100 = tpu.matmul %66, %1, %cst_37 {dimension_numbers = #tpu.dot_dimension_numbers<[1], [0], [0], [1], [0, 0, 1, 1], [], []>} : vector<1x16xf32>, vector<16x64xf32>, vector<1x64xf32> -> vector<1x64xf32>
    %101 = arith.addf %99, %100 : vector<1x64xf32>
    %102 = vector.extract_strided_slice %101 {offsets = [0, 0], sizes = [1, 48], strides = [1, 1]} : vector<1x64xf32> to vector<1x48xf32>
    %103 = arith.negf %102 : vector<1x48xf32>
    %104 = math.exp %103 : vector<1x48xf32>
    %cst_38 = arith.constant 1.000000e+00 : f32
    %105 = vector.broadcast %cst_38 : f32 to vector<1x48xf32>
    %106 = arith.addf %105, %104 : vector<1x48xf32>
    %107 = arith.divf %105, %106 : vector<1x48xf32>
    %108 = vector.extract_strided_slice %101 {offsets = [0, 48], sizes = [1, 16], strides = [1, 1]} : vector<1x64xf32> to vector<1x16xf32>
    %109 = math.tanh %108 : vector<1x16xf32>
    %110 = vector.extract_strided_slice %107 {offsets = [0, 0], sizes = [1, 16], strides = [1, 1]} : vector<1x48xf32> to vector<1x16xf32>
    %111 = vector.extract_strided_slice %107 {offsets = [0, 16], sizes = [1, 16], strides = [1, 1]} : vector<1x48xf32> to vector<1x16xf32>
    %112 = vector.extract_strided_slice %107 {offsets = [0, 32], sizes = [1, 16], strides = [1, 1]} : vector<1x48xf32> to vector<1x16xf32>
    %113 = arith.mulf %111, %64 : vector<1x16xf32>
    %114 = arith.mulf %110, %109 : vector<1x16xf32>
    %115 = arith.addf %113, %114 : vector<1x16xf32>
    %116 = math.tanh %115 : vector<1x16xf32>
    %117 = arith.mulf %112, %116 : vector<1x16xf32>
    %118 = vector.extract_strided_slice %11 {offsets = [2, 0], sizes = [1, 128], strides = [1, 1]} : vector<8x128xf32> to vector<1x128xf32>
    %cst_39 = arith.constant dense<0.000000e+00> : vector<1x128xf32>
    %119 = tpu.matmul %85, %0, %cst_39 {dimension_numbers = #tpu.dot_dimension_numbers<[1], [0], [0], [1], [0, 0, 1, 1], [], []>} : vector<1x32xf32>, vector<32x128xf32>, vector<1x128xf32> -> vector<1x128xf32>
    %120 = arith.addf %118, %119 : vector<1x128xf32>
    %121 = vector.extract_strided_slice %120 {offsets = [0, 0], sizes = [1, 96], strides = [1, 1]} : vector<1x128xf32> to vector<1x96xf32>
    %122 = arith.negf %121 : vector<1x96xf32>
    %123 = math.exp %122 : vector<1x96xf32>
    %cst_40 = arith.constant 1.000000e+00 : f32
    %124 = vector.broadcast %cst_40 : f32 to vector<1x96xf32>
    %125 = arith.addf %124, %123 : vector<1x96xf32>
    %126 = arith.divf %124, %125 : vector<1x96xf32>
    %127 = vector.extract_strided_slice %120 {offsets = [0, 96], sizes = [1, 32], strides = [1, 1]} : vector<1x128xf32> to vector<1x32xf32>
    %128 = math.tanh %127 : vector<1x32xf32>
    %129 = vector.extract_strided_slice %126 {offsets = [0, 0], sizes = [1, 32], strides = [1, 1]} : vector<1x96xf32> to vector<1x32xf32>
    %130 = vector.extract_strided_slice %126 {offsets = [0, 32], sizes = [1, 32], strides = [1, 1]} : vector<1x96xf32> to vector<1x32xf32>
    %131 = vector.extract_strided_slice %126 {offsets = [0, 64], sizes = [1, 32], strides = [1, 1]} : vector<1x96xf32> to vector<1x32xf32>
    %132 = arith.mulf %130, %83 : vector<1x32xf32>
    %133 = arith.mulf %129, %128 : vector<1x32xf32>
    %134 = arith.addf %132, %133 : vector<1x32xf32>
    %135 = math.tanh %134 : vector<1x32xf32>
    %136 = arith.mulf %131, %135 : vector<1x32xf32>
    %cst_41 = arith.constant dense<0.000000e+00> : vector<1x32xf32>
    %137 = tpu.matmul %136, %3, %cst_41 {dimension_numbers = #tpu.dot_dimension_numbers<[1], [0], [0], [1], [0, 0, 1, 1], [], []>} : vector<1x32xf32>, vector<32x32xf32>, vector<1x32xf32> -> vector<1x32xf32>
    %138 = arith.addf %137, %4 : vector<1x32xf32>
    %cst_42 = arith.constant 0.000000e+00 : f32
    %139 = vector.broadcast %cst_42 : f32 to vector<1x32xf32>
    %140 = arith.maximumf %138, %139 : vector<1x32xf32>
    %141 = vector.extract_strided_slice %140 {offsets = [0, 0], sizes = [1, 16], strides = [1, 1]} : vector<1x32xf32> to vector<1x16xf32>
    %142 = vector.extract_strided_slice %140 {offsets = [0, 16], sizes = [1, 16], strides = [1, 1]} : vector<1x32xf32> to vector<1x16xf32>
    %cst_43 = arith.constant 5.000000e-01 : f32
    %143 = vector.broadcast %cst_43 : f32 to vector<1x16xf32>
    %144 = arith.mulf %143, %142 : vector<1x16xf32>
    %145 = math.exp %144 : vector<1x16xf32>
    %cst_44 = arith.constant 9.99999993E-9 : f32
    %146 = vector.broadcast %cst_44 : f32 to vector<1x16xf32>
    %147 = arith.mulf %146, %145 : vector<1x16xf32>
    %148 = arith.addf %141, %147 : vector<1x16xf32>
    %cst_45 = arith.constant dense<0.000000e+00> : vector<1x64xf32>
    %149 = tpu.matmul %148, %2, %cst_45 {dimension_numbers = #tpu.dot_dimension_numbers<[1], [0], [0], [1], [0, 0, 1, 1], [], []>} : vector<1x16xf32>, vector<16x64xf32>, vector<1x64xf32> -> vector<1x64xf32>
    %150 = arith.addf %149, %5 : vector<1x64xf32>
    %cst_46 = arith.constant dense<0.000000e+00> : vector<1x64xf32>
    %151 = tpu.matmul %117, %1, %cst_46 {dimension_numbers = #tpu.dot_dimension_numbers<[1], [0], [0], [1], [0, 0, 1, 1], [], []>} : vector<1x16xf32>, vector<16x64xf32>, vector<1x64xf32> -> vector<1x64xf32>
    %152 = arith.addf %150, %151 : vector<1x64xf32>
    %153 = vector.extract_strided_slice %152 {offsets = [0, 0], sizes = [1, 48], strides = [1, 1]} : vector<1x64xf32> to vector<1x48xf32>
    %154 = arith.negf %153 : vector<1x48xf32>
    %155 = math.exp %154 : vector<1x48xf32>
    %cst_47 = arith.constant 1.000000e+00 : f32
    %156 = vector.broadcast %cst_47 : f32 to vector<1x48xf32>
    %157 = arith.addf %156, %155 : vector<1x48xf32>
    %158 = arith.divf %156, %157 : vector<1x48xf32>
    %159 = vector.extract_strided_slice %152 {offsets = [0, 48], sizes = [1, 16], strides = [1, 1]} : vector<1x64xf32> to vector<1x16xf32>
    %160 = math.tanh %159 : vector<1x16xf32>
    %161 = vector.extract_strided_slice %158 {offsets = [0, 0], sizes = [1, 16], strides = [1, 1]} : vector<1x48xf32> to vector<1x16xf32>
    %162 = vector.extract_strided_slice %158 {offsets = [0, 16], sizes = [1, 16], strides = [1, 1]} : vector<1x48xf32> to vector<1x16xf32>
    %163 = vector.extract_strided_slice %158 {offsets = [0, 32], sizes = [1, 16], strides = [1, 1]} : vector<1x48xf32> to vector<1x16xf32>
    %164 = arith.mulf %162, %115 : vector<1x16xf32>
    %165 = arith.mulf %161, %160 : vector<1x16xf32>
    %166 = arith.addf %164, %165 : vector<1x16xf32>
    %167 = math.tanh %166 : vector<1x16xf32>
    %168 = arith.mulf %163, %167 : vector<1x16xf32>
    %169 = vector.extract_strided_slice %11 {offsets = [3, 0], sizes = [1, 128], strides = [1, 1]} : vector<8x128xf32> to vector<1x128xf32>
    %cst_48 = arith.constant dense<0.000000e+00> : vector<1x128xf32>
    %170 = tpu.matmul %136, %0, %cst_48 {dimension_numbers = #tpu.dot_dimension_numbers<[1], [0], [0], [1], [0, 0, 1, 1], [], []>} : vector<1x32xf32>, vector<32x128xf32>, vector<1x128xf32> -> vector<1x128xf32>
    %171 = arith.addf %169, %170 : vector<1x128xf32>
    %172 = vector.extract_strided_slice %171 {offsets = [0, 0], sizes = [1, 96], strides = [1, 1]} : vector<1x128xf32> to vector<1x96xf32>
    %173 = arith.negf %172 : vector<1x96xf32>
    %174 = math.exp %173 : vector<1x96xf32>
    %cst_49 = arith.constant 1.000000e+00 : f32
    %175 = vector.broadcast %cst_49 : f32 to vector<1x96xf32>
    %176 = arith.addf %175, %174 : vector<1x96xf32>
    %177 = arith.divf %175, %176 : vector<1x96xf32>
    %178 = vector.extract_strided_slice %171 {offsets = [0, 96], sizes = [1, 32], strides = [1, 1]} : vector<1x128xf32> to vector<1x32xf32>
    %179 = math.tanh %178 : vector<1x32xf32>
    %180 = vector.extract_strided_slice %177 {offsets = [0, 0], sizes = [1, 32], strides = [1, 1]} : vector<1x96xf32> to vector<1x32xf32>
    %181 = vector.extract_strided_slice %177 {offsets = [0, 32], sizes = [1, 32], strides = [1, 1]} : vector<1x96xf32> to vector<1x32xf32>
    %182 = vector.extract_strided_slice %177 {offsets = [0, 64], sizes = [1, 32], strides = [1, 1]} : vector<1x96xf32> to vector<1x32xf32>
    %183 = arith.mulf %181, %134 : vector<1x32xf32>
    %184 = arith.mulf %180, %179 : vector<1x32xf32>
    %185 = arith.addf %183, %184 : vector<1x32xf32>
    %186 = math.tanh %185 : vector<1x32xf32>
    %187 = arith.mulf %182, %186 : vector<1x32xf32>
    %cst_50 = arith.constant dense<0.000000e+00> : vector<1x32xf32>
    %188 = tpu.matmul %187, %3, %cst_50 {dimension_numbers = #tpu.dot_dimension_numbers<[1], [0], [0], [1], [0, 0, 1, 1], [], []>} : vector<1x32xf32>, vector<32x32xf32>, vector<1x32xf32> -> vector<1x32xf32>
    %189 = arith.addf %188, %4 : vector<1x32xf32>
    %cst_51 = arith.constant 0.000000e+00 : f32
    %190 = vector.broadcast %cst_51 : f32 to vector<1x32xf32>
    %191 = arith.maximumf %189, %190 : vector<1x32xf32>
    %192 = vector.extract_strided_slice %191 {offsets = [0, 0], sizes = [1, 16], strides = [1, 1]} : vector<1x32xf32> to vector<1x16xf32>
    %193 = vector.extract_strided_slice %191 {offsets = [0, 16], sizes = [1, 16], strides = [1, 1]} : vector<1x32xf32> to vector<1x16xf32>
    %cst_52 = arith.constant 5.000000e-01 : f32
    %194 = vector.broadcast %cst_52 : f32 to vector<1x16xf32>
    %195 = arith.mulf %194, %193 : vector<1x16xf32>
    %196 = math.exp %195 : vector<1x16xf32>
    %cst_53 = arith.constant 9.99999993E-9 : f32
    %197 = vector.broadcast %cst_53 : f32 to vector<1x16xf32>
    %198 = arith.mulf %197, %196 : vector<1x16xf32>
    %199 = arith.addf %192, %198 : vector<1x16xf32>
    %cst_54 = arith.constant dense<0.000000e+00> : vector<1x64xf32>
    %200 = tpu.matmul %199, %2, %cst_54 {dimension_numbers = #tpu.dot_dimension_numbers<[1], [0], [0], [1], [0, 0, 1, 1], [], []>} : vector<1x16xf32>, vector<16x64xf32>, vector<1x64xf32> -> vector<1x64xf32>
    %201 = arith.addf %200, %5 : vector<1x64xf32>
    %cst_55 = arith.constant dense<0.000000e+00> : vector<1x64xf32>
    %202 = tpu.matmul %168, %1, %cst_55 {dimension_numbers = #tpu.dot_dimension_numbers<[1], [0], [0], [1], [0, 0, 1, 1], [], []>} : vector<1x16xf32>, vector<16x64xf32>, vector<1x64xf32> -> vector<1x64xf32>
    %203 = arith.addf %201, %202 : vector<1x64xf32>
    %204 = vector.extract_strided_slice %203 {offsets = [0, 0], sizes = [1, 48], strides = [1, 1]} : vector<1x64xf32> to vector<1x48xf32>
    %205 = arith.negf %204 : vector<1x48xf32>
    %206 = math.exp %205 : vector<1x48xf32>
    %cst_56 = arith.constant 1.000000e+00 : f32
    %207 = vector.broadcast %cst_56 : f32 to vector<1x48xf32>
    %208 = arith.addf %207, %206 : vector<1x48xf32>
    %209 = arith.divf %207, %208 : vector<1x48xf32>
    %210 = vector.extract_strided_slice %203 {offsets = [0, 48], sizes = [1, 16], strides = [1, 1]} : vector<1x64xf32> to vector<1x16xf32>
    %211 = math.tanh %210 : vector<1x16xf32>
    %212 = vector.extract_strided_slice %209 {offsets = [0, 0], sizes = [1, 16], strides = [1, 1]} : vector<1x48xf32> to vector<1x16xf32>
    %213 = vector.extract_strided_slice %209 {offsets = [0, 16], sizes = [1, 16], strides = [1, 1]} : vector<1x48xf32> to vector<1x16xf32>
    %214 = vector.extract_strided_slice %209 {offsets = [0, 32], sizes = [1, 16], strides = [1, 1]} : vector<1x48xf32> to vector<1x16xf32>
    %215 = arith.mulf %213, %166 : vector<1x16xf32>
    %216 = arith.mulf %212, %211 : vector<1x16xf32>
    %217 = arith.addf %215, %216 : vector<1x16xf32>
    %218 = math.tanh %217 : vector<1x16xf32>
    %219 = arith.mulf %214, %218 : vector<1x16xf32>
    %220 = vector.extract_strided_slice %11 {offsets = [4, 0], sizes = [1, 128], strides = [1, 1]} : vector<8x128xf32> to vector<1x128xf32>
    %cst_57 = arith.constant dense<0.000000e+00> : vector<1x128xf32>
    %221 = tpu.matmul %187, %0, %cst_57 {dimension_numbers = #tpu.dot_dimension_numbers<[1], [0], [0], [1], [0, 0, 1, 1], [], []>} : vector<1x32xf32>, vector<32x128xf32>, vector<1x128xf32> -> vector<1x128xf32>
    %222 = arith.addf %220, %221 : vector<1x128xf32>
    %223 = vector.extract_strided_slice %222 {offsets = [0, 0], sizes = [1, 96], strides = [1, 1]} : vector<1x128xf32> to vector<1x96xf32>
    %224 = arith.negf %223 : vector<1x96xf32>
    %225 = math.exp %224 : vector<1x96xf32>
    %cst_58 = arith.constant 1.000000e+00 : f32
    %226 = vector.broadcast %cst_58 : f32 to vector<1x96xf32>
    %227 = arith.addf %226, %225 : vector<1x96xf32>
    %228 = arith.divf %226, %227 : vector<1x96xf32>
    %229 = vector.extract_strided_slice %222 {offsets = [0, 96], sizes = [1, 32], strides = [1, 1]} : vector<1x128xf32> to vector<1x32xf32>
    %230 = math.tanh %229 : vector<1x32xf32>
    %231 = vector.extract_strided_slice %228 {offsets = [0, 0], sizes = [1, 32], strides = [1, 1]} : vector<1x96xf32> to vector<1x32xf32>
    %232 = vector.extract_strided_slice %228 {offsets = [0, 32], sizes = [1, 32], strides = [1, 1]} : vector<1x96xf32> to vector<1x32xf32>
    %233 = vector.extract_strided_slice %228 {offsets = [0, 64], sizes = [1, 32], strides = [1, 1]} : vector<1x96xf32> to vector<1x32xf32>
    %234 = arith.mulf %232, %185 : vector<1x32xf32>
    %235 = arith.mulf %231, %230 : vector<1x32xf32>
    %236 = arith.addf %234, %235 : vector<1x32xf32>
    %237 = math.tanh %236 : vector<1x32xf32>
    %238 = arith.mulf %233, %237 : vector<1x32xf32>
    %cst_59 = arith.constant dense<0.000000e+00> : vector<1x32xf32>
    %239 = tpu.matmul %238, %3, %cst_59 {dimension_numbers = #tpu.dot_dimension_numbers<[1], [0], [0], [1], [0, 0, 1, 1], [], []>} : vector<1x32xf32>, vector<32x32xf32>, vector<1x32xf32> -> vector<1x32xf32>
    %240 = arith.addf %239, %4 : vector<1x32xf32>
    %cst_60 = arith.constant 0.000000e+00 : f32
    %241 = vector.broadcast %cst_60 : f32 to vector<1x32xf32>
    %242 = arith.maximumf %240, %241 : vector<1x32xf32>
    %243 = vector.extract_strided_slice %242 {offsets = [0, 0], sizes = [1, 16], strides = [1, 1]} : vector<1x32xf32> to vector<1x16xf32>
    %244 = vector.extract_strided_slice %242 {offsets = [0, 16], sizes = [1, 16], strides = [1, 1]} : vector<1x32xf32> to vector<1x16xf32>
    %cst_61 = arith.constant 5.000000e-01 : f32
    %245 = vector.broadcast %cst_61 : f32 to vector<1x16xf32>
    %246 = arith.mulf %245, %244 : vector<1x16xf32>
    %247 = math.exp %246 : vector<1x16xf32>
    %cst_62 = arith.constant 9.99999993E-9 : f32
    %248 = vector.broadcast %cst_62 : f32 to vector<1x16xf32>
    %249 = arith.mulf %248, %247 : vector<1x16xf32>
    %250 = arith.addf %243, %249 : vector<1x16xf32>
    %cst_63 = arith.constant dense<0.000000e+00> : vector<1x64xf32>
    %251 = tpu.matmul %250, %2, %cst_63 {dimension_numbers = #tpu.dot_dimension_numbers<[1], [0], [0], [1], [0, 0, 1, 1], [], []>} : vector<1x16xf32>, vector<16x64xf32>, vector<1x64xf32> -> vector<1x64xf32>
    %252 = arith.addf %251, %5 : vector<1x64xf32>
    %cst_64 = arith.constant dense<0.000000e+00> : vector<1x64xf32>
    %253 = tpu.matmul %219, %1, %cst_64 {dimension_numbers = #tpu.dot_dimension_numbers<[1], [0], [0], [1], [0, 0, 1, 1], [], []>} : vector<1x16xf32>, vector<16x64xf32>, vector<1x64xf32> -> vector<1x64xf32>
    %254 = arith.addf %252, %253 : vector<1x64xf32>
    %255 = vector.extract_strided_slice %254 {offsets = [0, 0], sizes = [1, 48], strides = [1, 1]} : vector<1x64xf32> to vector<1x48xf32>
    %256 = arith.negf %255 : vector<1x48xf32>
    %257 = math.exp %256 : vector<1x48xf32>
    %cst_65 = arith.constant 1.000000e+00 : f32
    %258 = vector.broadcast %cst_65 : f32 to vector<1x48xf32>
    %259 = arith.addf %258, %257 : vector<1x48xf32>
    %260 = arith.divf %258, %259 : vector<1x48xf32>
    %261 = vector.extract_strided_slice %254 {offsets = [0, 48], sizes = [1, 16], strides = [1, 1]} : vector<1x64xf32> to vector<1x16xf32>
    %262 = math.tanh %261 : vector<1x16xf32>
    %263 = vector.extract_strided_slice %260 {offsets = [0, 0], sizes = [1, 16], strides = [1, 1]} : vector<1x48xf32> to vector<1x16xf32>
    %264 = vector.extract_strided_slice %260 {offsets = [0, 16], sizes = [1, 16], strides = [1, 1]} : vector<1x48xf32> to vector<1x16xf32>
    %265 = vector.extract_strided_slice %260 {offsets = [0, 32], sizes = [1, 16], strides = [1, 1]} : vector<1x48xf32> to vector<1x16xf32>
    %266 = arith.mulf %264, %217 : vector<1x16xf32>
    %267 = arith.mulf %263, %262 : vector<1x16xf32>
    %268 = arith.addf %266, %267 : vector<1x16xf32>
    %269 = math.tanh %268 : vector<1x16xf32>
    %270 = arith.mulf %265, %269 : vector<1x16xf32>
    %271 = vector.extract_strided_slice %11 {offsets = [5, 0], sizes = [1, 128], strides = [1, 1]} : vector<8x128xf32> to vector<1x128xf32>
    %cst_66 = arith.constant dense<0.000000e+00> : vector<1x128xf32>
    %272 = tpu.matmul %238, %0, %cst_66 {dimension_numbers = #tpu.dot_dimension_numbers<[1], [0], [0], [1], [0, 0, 1, 1], [], []>} : vector<1x32xf32>, vector<32x128xf32>, vector<1x128xf32> -> vector<1x128xf32>
    %273 = arith.addf %271, %272 : vector<1x128xf32>
    %274 = vector.extract_strided_slice %273 {offsets = [0, 0], sizes = [1, 96], strides = [1, 1]} : vector<1x128xf32> to vector<1x96xf32>
    %275 = arith.negf %274 : vector<1x96xf32>
    %276 = math.exp %275 : vector<1x96xf32>
    %cst_67 = arith.constant 1.000000e+00 : f32
    %277 = vector.broadcast %cst_67 : f32 to vector<1x96xf32>
    %278 = arith.addf %277, %276 : vector<1x96xf32>
    %279 = arith.divf %277, %278 : vector<1x96xf32>
    %280 = vector.extract_strided_slice %273 {offsets = [0, 96], sizes = [1, 32], strides = [1, 1]} : vector<1x128xf32> to vector<1x32xf32>
    %281 = math.tanh %280 : vector<1x32xf32>
    %282 = vector.extract_strided_slice %279 {offsets = [0, 0], sizes = [1, 32], strides = [1, 1]} : vector<1x96xf32> to vector<1x32xf32>
    %283 = vector.extract_strided_slice %279 {offsets = [0, 32], sizes = [1, 32], strides = [1, 1]} : vector<1x96xf32> to vector<1x32xf32>
    %284 = vector.extract_strided_slice %279 {offsets = [0, 64], sizes = [1, 32], strides = [1, 1]} : vector<1x96xf32> to vector<1x32xf32>
    %285 = arith.mulf %283, %236 : vector<1x32xf32>
    %286 = arith.mulf %282, %281 : vector<1x32xf32>
    %287 = arith.addf %285, %286 : vector<1x32xf32>
    %288 = math.tanh %287 : vector<1x32xf32>
    %289 = arith.mulf %284, %288 : vector<1x32xf32>
    %cst_68 = arith.constant dense<0.000000e+00> : vector<1x32xf32>
    %290 = tpu.matmul %289, %3, %cst_68 {dimension_numbers = #tpu.dot_dimension_numbers<[1], [0], [0], [1], [0, 0, 1, 1], [], []>} : vector<1x32xf32>, vector<32x32xf32>, vector<1x32xf32> -> vector<1x32xf32>
    %291 = arith.addf %290, %4 : vector<1x32xf32>
    %cst_69 = arith.constant 0.000000e+00 : f32
    %292 = vector.broadcast %cst_69 : f32 to vector<1x32xf32>
    %293 = arith.maximumf %291, %292 : vector<1x32xf32>
    %294 = vector.extract_strided_slice %293 {offsets = [0, 0], sizes = [1, 16], strides = [1, 1]} : vector<1x32xf32> to vector<1x16xf32>
    %295 = vector.extract_strided_slice %293 {offsets = [0, 16], sizes = [1, 16], strides = [1, 1]} : vector<1x32xf32> to vector<1x16xf32>
    %cst_70 = arith.constant 5.000000e-01 : f32
    %296 = vector.broadcast %cst_70 : f32 to vector<1x16xf32>
    %297 = arith.mulf %296, %295 : vector<1x16xf32>
    %298 = math.exp %297 : vector<1x16xf32>
    %cst_71 = arith.constant 9.99999993E-9 : f32
    %299 = vector.broadcast %cst_71 : f32 to vector<1x16xf32>
    %300 = arith.mulf %299, %298 : vector<1x16xf32>
    %301 = arith.addf %294, %300 : vector<1x16xf32>
    %cst_72 = arith.constant dense<0.000000e+00> : vector<1x64xf32>
    %302 = tpu.matmul %301, %2, %cst_72 {dimension_numbers = #tpu.dot_dimension_numbers<[1], [0], [0], [1], [0, 0, 1, 1], [], []>} : vector<1x16xf32>, vector<16x64xf32>, vector<1x64xf32> -> vector<1x64xf32>
    %303 = arith.addf %302, %5 : vector<1x64xf32>
    %cst_73 = arith.constant dense<0.000000e+00> : vector<1x64xf32>
    %304 = tpu.matmul %270, %1, %cst_73 {dimension_numbers = #tpu.dot_dimension_numbers<[1], [0], [0], [1], [0, 0, 1, 1], [], []>} : vector<1x16xf32>, vector<16x64xf32>, vector<1x64xf32> -> vector<1x64xf32>
    %305 = arith.addf %303, %304 : vector<1x64xf32>
    %306 = vector.extract_strided_slice %305 {offsets = [0, 0], sizes = [1, 48], strides = [1, 1]} : vector<1x64xf32> to vector<1x48xf32>
    %307 = arith.negf %306 : vector<1x48xf32>
    %308 = math.exp %307 : vector<1x48xf32>
    %cst_74 = arith.constant 1.000000e+00 : f32
    %309 = vector.broadcast %cst_74 : f32 to vector<1x48xf32>
    %310 = arith.addf %309, %308 : vector<1x48xf32>
    %311 = arith.divf %309, %310 : vector<1x48xf32>
    %312 = vector.extract_strided_slice %305 {offsets = [0, 48], sizes = [1, 16], strides = [1, 1]} : vector<1x64xf32> to vector<1x16xf32>
    %313 = math.tanh %312 : vector<1x16xf32>
    %314 = vector.extract_strided_slice %311 {offsets = [0, 0], sizes = [1, 16], strides = [1, 1]} : vector<1x48xf32> to vector<1x16xf32>
    %315 = vector.extract_strided_slice %311 {offsets = [0, 16], sizes = [1, 16], strides = [1, 1]} : vector<1x48xf32> to vector<1x16xf32>
    %316 = vector.extract_strided_slice %311 {offsets = [0, 32], sizes = [1, 16], strides = [1, 1]} : vector<1x48xf32> to vector<1x16xf32>
    %317 = arith.mulf %315, %268 : vector<1x16xf32>
    %318 = arith.mulf %314, %313 : vector<1x16xf32>
    %319 = arith.addf %317, %318 : vector<1x16xf32>
    %320 = math.tanh %319 : vector<1x16xf32>
    %321 = arith.mulf %316, %320 : vector<1x16xf32>
    %322 = vector.extract_strided_slice %11 {offsets = [6, 0], sizes = [1, 128], strides = [1, 1]} : vector<8x128xf32> to vector<1x128xf32>
    %cst_75 = arith.constant dense<0.000000e+00> : vector<1x128xf32>
    %323 = tpu.matmul %289, %0, %cst_75 {dimension_numbers = #tpu.dot_dimension_numbers<[1], [0], [0], [1], [0, 0, 1, 1], [], []>} : vector<1x32xf32>, vector<32x128xf32>, vector<1x128xf32> -> vector<1x128xf32>
    %324 = arith.addf %322, %323 : vector<1x128xf32>
    %325 = vector.extract_strided_slice %324 {offsets = [0, 0], sizes = [1, 96], strides = [1, 1]} : vector<1x128xf32> to vector<1x96xf32>
    %326 = arith.negf %325 : vector<1x96xf32>
    %327 = math.exp %326 : vector<1x96xf32>
    %cst_76 = arith.constant 1.000000e+00 : f32
    %328 = vector.broadcast %cst_76 : f32 to vector<1x96xf32>
    %329 = arith.addf %328, %327 : vector<1x96xf32>
    %330 = arith.divf %328, %329 : vector<1x96xf32>
    %331 = vector.extract_strided_slice %324 {offsets = [0, 96], sizes = [1, 32], strides = [1, 1]} : vector<1x128xf32> to vector<1x32xf32>
    %332 = math.tanh %331 : vector<1x32xf32>
    %333 = vector.extract_strided_slice %330 {offsets = [0, 0], sizes = [1, 32], strides = [1, 1]} : vector<1x96xf32> to vector<1x32xf32>
    %334 = vector.extract_strided_slice %330 {offsets = [0, 32], sizes = [1, 32], strides = [1, 1]} : vector<1x96xf32> to vector<1x32xf32>
    %335 = vector.extract_strided_slice %330 {offsets = [0, 64], sizes = [1, 32], strides = [1, 1]} : vector<1x96xf32> to vector<1x32xf32>
    %336 = arith.mulf %334, %287 : vector<1x32xf32>
    %337 = arith.mulf %333, %332 : vector<1x32xf32>
    %338 = arith.addf %336, %337 : vector<1x32xf32>
    %339 = math.tanh %338 : vector<1x32xf32>
    %340 = arith.mulf %335, %339 : vector<1x32xf32>
    %cst_77 = arith.constant dense<0.000000e+00> : vector<1x32xf32>
    %341 = tpu.matmul %340, %3, %cst_77 {dimension_numbers = #tpu.dot_dimension_numbers<[1], [0], [0], [1], [0, 0, 1, 1], [], []>} : vector<1x32xf32>, vector<32x32xf32>, vector<1x32xf32> -> vector<1x32xf32>
    %342 = arith.addf %341, %4 : vector<1x32xf32>
    %cst_78 = arith.constant 0.000000e+00 : f32
    %343 = vector.broadcast %cst_78 : f32 to vector<1x32xf32>
    %344 = arith.maximumf %342, %343 : vector<1x32xf32>
    %345 = vector.extract_strided_slice %344 {offsets = [0, 0], sizes = [1, 16], strides = [1, 1]} : vector<1x32xf32> to vector<1x16xf32>
    %346 = vector.extract_strided_slice %344 {offsets = [0, 16], sizes = [1, 16], strides = [1, 1]} : vector<1x32xf32> to vector<1x16xf32>
    %cst_79 = arith.constant 5.000000e-01 : f32
    %347 = vector.broadcast %cst_79 : f32 to vector<1x16xf32>
    %348 = arith.mulf %347, %346 : vector<1x16xf32>
    %349 = math.exp %348 : vector<1x16xf32>
    %cst_80 = arith.constant 9.99999993E-9 : f32
    %350 = vector.broadcast %cst_80 : f32 to vector<1x16xf32>
    %351 = arith.mulf %350, %349 : vector<1x16xf32>
    %352 = arith.addf %345, %351 : vector<1x16xf32>
    %cst_81 = arith.constant dense<0.000000e+00> : vector<1x64xf32>
    %353 = tpu.matmul %352, %2, %cst_81 {dimension_numbers = #tpu.dot_dimension_numbers<[1], [0], [0], [1], [0, 0, 1, 1], [], []>} : vector<1x16xf32>, vector<16x64xf32>, vector<1x64xf32> -> vector<1x64xf32>
    %354 = arith.addf %353, %5 : vector<1x64xf32>
    %cst_82 = arith.constant dense<0.000000e+00> : vector<1x64xf32>
    %355 = tpu.matmul %321, %1, %cst_82 {dimension_numbers = #tpu.dot_dimension_numbers<[1], [0], [0], [1], [0, 0, 1, 1], [], []>} : vector<1x16xf32>, vector<16x64xf32>, vector<1x64xf32> -> vector<1x64xf32>
    %356 = arith.addf %354, %355 : vector<1x64xf32>
    %357 = vector.extract_strided_slice %356 {offsets = [0, 0], sizes = [1, 48], strides = [1, 1]} : vector<1x64xf32> to vector<1x48xf32>
    %358 = arith.negf %357 : vector<1x48xf32>
    %359 = math.exp %358 : vector<1x48xf32>
    %cst_83 = arith.constant 1.000000e+00 : f32
    %360 = vector.broadcast %cst_83 : f32 to vector<1x48xf32>
    %361 = arith.addf %360, %359 : vector<1x48xf32>
    %362 = arith.divf %360, %361 : vector<1x48xf32>
    %363 = vector.extract_strided_slice %356 {offsets = [0, 48], sizes = [1, 16], strides = [1, 1]} : vector<1x64xf32> to vector<1x16xf32>
    %364 = math.tanh %363 : vector<1x16xf32>
    %365 = vector.extract_strided_slice %362 {offsets = [0, 0], sizes = [1, 16], strides = [1, 1]} : vector<1x48xf32> to vector<1x16xf32>
    %366 = vector.extract_strided_slice %362 {offsets = [0, 16], sizes = [1, 16], strides = [1, 1]} : vector<1x48xf32> to vector<1x16xf32>
    %367 = vector.extract_strided_slice %362 {offsets = [0, 32], sizes = [1, 16], strides = [1, 1]} : vector<1x48xf32> to vector<1x16xf32>
    %368 = arith.mulf %366, %319 : vector<1x16xf32>
    %369 = arith.mulf %365, %364 : vector<1x16xf32>
    %370 = arith.addf %368, %369 : vector<1x16xf32>
    %371 = math.tanh %370 : vector<1x16xf32>
    %372 = arith.mulf %367, %371 : vector<1x16xf32>
    %373 = vector.extract_strided_slice %11 {offsets = [7, 0], sizes = [1, 128], strides = [1, 1]} : vector<8x128xf32> to vector<1x128xf32>
    %cst_84 = arith.constant dense<0.000000e+00> : vector<1x128xf32>
    %374 = tpu.matmul %340, %0, %cst_84 {dimension_numbers = #tpu.dot_dimension_numbers<[1], [0], [0], [1], [0, 0, 1, 1], [], []>} : vector<1x32xf32>, vector<32x128xf32>, vector<1x128xf32> -> vector<1x128xf32>
    %375 = arith.addf %373, %374 : vector<1x128xf32>
    %376 = vector.extract_strided_slice %375 {offsets = [0, 0], sizes = [1, 96], strides = [1, 1]} : vector<1x128xf32> to vector<1x96xf32>
    %377 = arith.negf %376 : vector<1x96xf32>
    %378 = math.exp %377 : vector<1x96xf32>
    %cst_85 = arith.constant 1.000000e+00 : f32
    %379 = vector.broadcast %cst_85 : f32 to vector<1x96xf32>
    %380 = arith.addf %379, %378 : vector<1x96xf32>
    %381 = arith.divf %379, %380 : vector<1x96xf32>
    %382 = vector.extract_strided_slice %375 {offsets = [0, 96], sizes = [1, 32], strides = [1, 1]} : vector<1x128xf32> to vector<1x32xf32>
    %383 = math.tanh %382 : vector<1x32xf32>
    %384 = vector.extract_strided_slice %381 {offsets = [0, 0], sizes = [1, 32], strides = [1, 1]} : vector<1x96xf32> to vector<1x32xf32>
    %385 = vector.extract_strided_slice %381 {offsets = [0, 32], sizes = [1, 32], strides = [1, 1]} : vector<1x96xf32> to vector<1x32xf32>
    %386 = vector.extract_strided_slice %381 {offsets = [0, 64], sizes = [1, 32], strides = [1, 1]} : vector<1x96xf32> to vector<1x32xf32>
    %387 = arith.mulf %385, %338 : vector<1x32xf32>
    %388 = arith.mulf %384, %383 : vector<1x32xf32>
    %389 = arith.addf %387, %388 : vector<1x32xf32>
    %390 = math.tanh %389 : vector<1x32xf32>
    %391 = arith.mulf %386, %390 : vector<1x32xf32>
    %cst_86 = arith.constant dense<0.000000e+00> : vector<1x32xf32>
    %392 = tpu.matmul %391, %3, %cst_86 {dimension_numbers = #tpu.dot_dimension_numbers<[1], [0], [0], [1], [0, 0, 1, 1], [], []>} : vector<1x32xf32>, vector<32x32xf32>, vector<1x32xf32> -> vector<1x32xf32>
    %393 = arith.addf %392, %4 : vector<1x32xf32>
    %cst_87 = arith.constant 0.000000e+00 : f32
    %394 = vector.broadcast %cst_87 : f32 to vector<1x32xf32>
    %395 = arith.maximumf %393, %394 : vector<1x32xf32>
    %396 = vector.extract_strided_slice %395 {offsets = [0, 0], sizes = [1, 16], strides = [1, 1]} : vector<1x32xf32> to vector<1x16xf32>
    %397 = vector.extract_strided_slice %395 {offsets = [0, 16], sizes = [1, 16], strides = [1, 1]} : vector<1x32xf32> to vector<1x16xf32>
    %cst_88 = arith.constant 5.000000e-01 : f32
    %398 = vector.broadcast %cst_88 : f32 to vector<1x16xf32>
    %399 = arith.mulf %398, %397 : vector<1x16xf32>
    %400 = math.exp %399 : vector<1x16xf32>
    %cst_89 = arith.constant 9.99999993E-9 : f32
    %401 = vector.broadcast %cst_89 : f32 to vector<1x16xf32>
    %402 = arith.mulf %401, %400 : vector<1x16xf32>
    %403 = arith.addf %396, %402 : vector<1x16xf32>
    %cst_90 = arith.constant dense<0.000000e+00> : vector<1x64xf32>
    %404 = tpu.matmul %403, %2, %cst_90 {dimension_numbers = #tpu.dot_dimension_numbers<[1], [0], [0], [1], [0, 0, 1, 1], [], []>} : vector<1x16xf32>, vector<16x64xf32>, vector<1x64xf32> -> vector<1x64xf32>
    %405 = arith.addf %404, %5 : vector<1x64xf32>
    %cst_91 = arith.constant dense<0.000000e+00> : vector<1x64xf32>
    %406 = tpu.matmul %372, %1, %cst_91 {dimension_numbers = #tpu.dot_dimension_numbers<[1], [0], [0], [1], [0, 0, 1, 1], [], []>} : vector<1x16xf32>, vector<16x64xf32>, vector<1x64xf32> -> vector<1x64xf32>
    %407 = arith.addf %405, %406 : vector<1x64xf32>
    %408 = vector.extract_strided_slice %407 {offsets = [0, 0], sizes = [1, 48], strides = [1, 1]} : vector<1x64xf32> to vector<1x48xf32>
    %409 = arith.negf %408 : vector<1x48xf32>
    %410 = math.exp %409 : vector<1x48xf32>
    %cst_92 = arith.constant 1.000000e+00 : f32
    %411 = vector.broadcast %cst_92 : f32 to vector<1x48xf32>
    %412 = arith.addf %411, %410 : vector<1x48xf32>
    %413 = arith.divf %411, %412 : vector<1x48xf32>
    %414 = vector.extract_strided_slice %407 {offsets = [0, 48], sizes = [1, 16], strides = [1, 1]} : vector<1x64xf32> to vector<1x16xf32>
    %415 = math.tanh %414 : vector<1x16xf32>
    %416 = vector.extract_strided_slice %413 {offsets = [0, 0], sizes = [1, 16], strides = [1, 1]} : vector<1x48xf32> to vector<1x16xf32>
    %417 = vector.extract_strided_slice %413 {offsets = [0, 16], sizes = [1, 16], strides = [1, 1]} : vector<1x48xf32> to vector<1x16xf32>
    %418 = vector.extract_strided_slice %413 {offsets = [0, 32], sizes = [1, 16], strides = [1, 1]} : vector<1x48xf32> to vector<1x16xf32>
    %419 = arith.mulf %417, %370 : vector<1x16xf32>
    %420 = arith.mulf %416, %415 : vector<1x16xf32>
    %421 = arith.addf %419, %420 : vector<1x16xf32>
    %422 = math.tanh %421 : vector<1x16xf32>
    %423 = arith.mulf %418, %422 : vector<1x16xf32>
    %424 = tpu.concatenate %38, %89, %140, %191, %242, %293, %344, %395 in 0 : vector<1x32xf32>, vector<1x32xf32>, vector<1x32xf32>, vector<1x32xf32>, vector<1x32xf32>, vector<1x32xf32>, vector<1x32xf32>, vector<1x32xf32> -> vector<8x32xf32>
    %c0_93 = arith.constant 0 : index
    %c0_94 = arith.constant 0 : index
    %425 = vector.load %arg10[%c0_93, %c0_94] : memref<8x32xf32, #tpu.memory_space<vmem>>, vector<8x32xf32>
    tpu.vector_store %arg10[%c0_93, %c0_94], %424 {strides = array<i32>} : memref<8x32xf32, #tpu.memory_space<vmem>>, vector<8x32xf32>,
    %426 = tpu.concatenate %66, %117, %168, %219, %270, %321, %372, %423 in 0 : vector<1x16xf32>, vector<1x16xf32>, vector<1x16xf32>, vector<1x16xf32>, vector<1x16xf32>, vector<1x16xf32>, vector<1x16xf32>, vector<1x16xf32> -> vector<8x16xf32>
    %c0_95 = arith.constant 0 : index
    %c0_96 = arith.constant 0 : index
    %427 = vector.load %arg9[%c0_95, %c0_96] : memref<8x16xf32, #tpu.memory_space<vmem>>, vector<8x16xf32>
    tpu.vector_store %arg9[%c0_95, %c0_96], %426 {strides = array<i32>} : memref<8x16xf32, #tpu.memory_space<vmem>>, vector<8x16xf32>,
    return
  }
}

</mosaic_0001>

<bundles_post_ra>
// kernel: tpu_custom_call.1
= control target key start
LH: loop header
LB: loop body
LE: loop exit
PB: predicated region body
PF: predicated region fallthrough
CT: control target
= control target key end

     0   :  { %16 = vsyncpa [#allocation3], 0  ;;  %s4768_s0 = inlined_call_operand.hbm [shape: f32[8,16], index: 0, kind: input, shape index: {}]   ;;  %s4769_s1 = inlined_call_operand.hbm [shape: f32[16,128], index: 1, kind: input, shape index: {}]   ;;  %s4770_s2 = inlined_call_operand.hbm [shape: f32[32,128], index: 2, kind: input, shape index: {}]   ;;  %s4771_s3 = inlined_call_operand.vmem [shape: f32[1,128], index: 3, kind: input, shape index: {}]   ;;  %s4772_s4 = inlined_call_operand.hbm [shape: f32[32,32], index: 4, kind: input, shape index: {}]   ;;  %s4773_s5 = inlined_call_operand.vmem [shape: f32[1,32], index: 5, kind: input, shape index: {}]   ;;  %s4774_s6 = inlined_call_operand.vmem [shape: f32[16,64], index: 6, kind: input, shape index: {}]   ;;  %s4775_s7 = inlined_call_operand.hbm [shape: f32[16,64], index: 7, kind: input, shape index: {}]   ;;  %s4776_s8 = inlined_call_operand.vmem [shape: f32[1,64], index: 8, kind: input, shape index: {}]   ;;  %s4777_s9 = inlined_call_operand.hbm [shape: f32[8,16], index: 9, kind: output, shape index: {0}]   ;;  %s4778_s10 = inlined_call_operand.hbm [shape: f32[8,32], index: 10, kind: output, shape index: {1}]  }
   0x1   :  { %17 = vsyncpa [#allocation6], 0 }
   0x2   :  { %18 = vsyncpa [#allocation9], 0 }
   0x3   :  { %19 = vsyncpa [#allocation4], 0 }
   0x4   :  { %20 = vsyncpa [#allocation13], 0  ;;  %s4141_s13 = smov [#allocation5]   ;;  %s3977_s17 = scalar_lea.hbm %s4769_s1, 256 }
   0x5   :  { %s36_s14 = sshll.u32 %s4141_s13, 4  ;;  %p3978_p0 = scmp.ne.s32.totalorder %s4769_s1, %s3977_s17  ;;  %s37_s14 = int_to_ptr.vmem [resolvable:$true] %s36_s14 }
   0x6   :  { %p3981_p1 = scmp.lt.u32.totalorder %s3977_s17, %s4769_s1 }
   0x8   :  { %p3983_p2 = pnand %p3981_p1, %p3978_p0 }
   0xa   :  { %3986 = shalt.err (!%p3983_p2)
}
   0xb   :  { %s3987_s22 = scalar_lea.vmem %s37_s14, 256  ;;  %p3992_p4 = scmp.lt.s32.totalorder %s37_s14, %s37_s14 }
   0xc   :  { %p3988_p3 = scmp.ne.s32.totalorder %s37_s14, %s3987_s22  ;;  %p3993_p5 = scmp.lt.s32.totalorder %s3987_s22, %s3987_s22 }
   0xe   :  { %p3994_p6 = por %p3993_p5, %p3992_p4 }
  0x10   :  { %p3995_p7 = pnand %p3994_p6, %p3988_p3 }
  0x12   :  { %3998 = shalt.err (!%p3995_p7)
}
  0x13   :  { %s4142_s23 = smov 128   ;;  %s4143_s24 = smov 8  }
  0x14   :  { %42 = dma.hbm_to_vmem [thread:$0]  %s4769_s1, 256, %s37_s14, [#allocation6], %s4142_s23, %s4142_s23, %s4143_s24  }
  0x15   :  { %s4144_s27 = smov [#allocation8]   ;;  %s4145_s29 = smov [#allocation2]  }
  0x16   :  { %s62_s28 = sshll.u32 %s4144_s27, 4  ;;  %s27_s30 = sshll.u32 %s4145_s29, 4  ;;  %s63_s28 = int_to_ptr.vmem [resolvable:$true] %s62_s28  ;;  %s28_s30 = int_to_ptr.vmem [resolvable:$true] %s27_s30 }
  0x17   :  { %s3999_s13 = scalar_lea.hbm %s4772_s4, 512 }
  0x18   :  { %p4000_p8 = scmp.ne.s32.totalorder %s4772_s4, %s3999_s13  ;;  %p4003_p9 = scmp.lt.u32.totalorder %s3999_s13, %s4772_s4 }
  0x1a   :  { %p4005_p10 = pnand %p4003_p9, %p4000_p8 }
  0x1c   :  { %4008 = shalt.err (!%p4005_p10)
}
  0x1d   :  { %s4009_s1 = scalar_lea.vmem %s63_s28, 512  ;;  %p4014_p12 = scmp.lt.s32.totalorder %s63_s28, %s63_s28 }
  0x1e   :  { %p4010_p11 = scmp.ne.s32.totalorder %s63_s28, %s4009_s1  ;;  %p4015_p13 = scmp.lt.s32.totalorder %s4009_s1, %s4009_s1 }
  0x20   :  { %p4016_p0 = por %p4015_p13, %p4014_p12 }
  0x22   :  { %p4017_p1 = pnand %p4016_p0, %p4010_p11 }
  0x24   :  { %4020 = shalt.err (!%p4017_p1)
}
  0x25   :  { %68 = dma.hbm_to_vmem [thread:$0]  %s4772_s4, 512, %s63_s28, [#allocation9], %s4142_s23, %s4142_s23, %s4143_s24  }
  0x26   :  { %s4021_s22 = scalar_lea.hbm %s4768_s0, 128 }
  0x27   :  { %p4022_p2 = scmp.ne.s32.totalorder %s4768_s0, %s4021_s22  ;;  %p4025_p3 = scmp.lt.u32.totalorder %s4021_s22, %s4768_s0 }
  0x29   :  { %p4027_p4 = pnand %p4025_p3, %p4022_p2 }
  0x2b   :  { %4030 = shalt.err (!%p4027_p4)
}
  0x2c   :  { %s4031_s11 = scalar_lea.vmem %s28_s30, 128  ;;  %p4036_p6 = scmp.lt.s32.totalorder %s28_s30, %s28_s30 }
  0x2d   :  { %p4032_p5 = scmp.ne.s32.totalorder %s28_s30, %s4031_s11  ;;  %p4037_p7 = scmp.lt.s32.totalorder %s4031_s11, %s4031_s11 }
  0x2f   :  { %p4038_p8 = por %p4037_p7, %p4036_p6 }
  0x31   :  { %p4039_p9 = pnand %p4038_p8, %p4032_p5 }
  0x33   :  { %4042 = shalt.err (!%p4039_p9)
}
  0x34   :  { %30 = dma.hbm_to_vmem [thread:$0]  %s4768_s0, 128, %s28_s30, [#allocation3]  }
  0x35   :  { %s4146_s12 = smov [#allocation7]   ;;  %s4147_s15 = smov [#allocation10]  }
  0x36   :  { %s48_s13 = sshll.u32 %s4146_s12, 4  ;;  %s78_s16 = sshll.u32 %s4147_s15, 4  ;;  %s49_s13 = int_to_ptr.vmem [resolvable:$true] %s48_s13  ;;  %s79_s16 = int_to_ptr.vmem [resolvable:$true] %s78_s16 }
  0x37   :  { %s4043_s1 = scalar_lea.hbm %s4770_s2, 512 }
  0x38   :  { %p4044_p10 = scmp.ne.s32.totalorder %s4770_s2, %s4043_s1  ;;  %p4047_p11 = scmp.lt.u32.totalorder %s4043_s1, %s4770_s2 }
  0x3a   :  { %p4049_p12 = pnand %p4047_p11, %p4044_p10 }
  0x3c   :  { %4052 = shalt.err (!%p4049_p12)
}
  0x3d   :  { %s4053_s0 = scalar_lea.vmem %s49_s13, 512  ;;  %p4058_p0 = scmp.lt.s32.totalorder %s49_s13, %s49_s13 }
  0x3e   :  { %p4054_p13 = scmp.ne.s32.totalorder %s49_s13, %s4053_s0  ;;  %p4059_p1 = scmp.lt.s32.totalorder %s4053_s0, %s4053_s0 }
  0x40   :  { %p4060_p2 = por %p4059_p1, %p4058_p0 }
  0x42   :  { %p4061_p3 = pnand %p4060_p2, %p4054_p13 }
  0x44   :  { %4064 = shalt.err (!%p4061_p3)
}
  0x45   :  { %54 = dma.hbm_to_vmem [thread:$0]  %s4770_s2, 512, %s49_s13, [#allocation6], %s4142_s23, %s4142_s23, %s4143_s24  }
  0x46   :  { %s4065_s27 = scalar_lea.hbm %s4775_s7, 256 }
  0x47   :  { %p4066_p4 = scmp.ne.s32.totalorder %s4775_s7, %s4065_s27  ;;  %p4069_p5 = scmp.lt.u32.totalorder %s4065_s27, %s4775_s7 }
  0x49   :  { %p4071_p6 = pnand %p4069_p5, %p4066_p4 }
  0x4b   :  { %4074 = shalt.err (!%p4071_p6)
}
  0x4c   :  { %s4075_s12 = scalar_lea.vmem %s79_s16, 256  ;;  %p4080_p8 = scmp.lt.s32.totalorder %s79_s16, %s79_s16 }
  0x4d   :  { %p4076_p7 = scmp.ne.s32.totalorder %s79_s16, %s4075_s12  ;;  %p4081_p9 = scmp.lt.s32.totalorder %s4075_s12, %s4075_s12 }
  0x4f   :  { %p4082_p10 = por %p4081_p9, %p4080_p8 }
  0x51   :  { %p4083_p11 = pnand %p4082_p10, %p4076_p7 }
  0x53   :  { %4086 = shalt.err (!%p4083_p11)
}
  0x54   :  { %84 = dma.hbm_to_vmem [thread:$0]  %s4775_s7, 256, %s79_s16, [#allocation9], %s4142_s23, %s4142_s23, %s4143_s24  }
  0x55   :  { %4131 = dma.done.wait [#allocation3], 128  }
  0x56   :  { %4132 = vsyncadd [#allocation3], 4294967168 }
  0x57   :  { %4133 = dma.done.wait [#allocation6], 768  }
  0x58   :  { %4134 = vsyncadd [#allocation6], 4294966528 }
  0x59   :  { %4135 = dma.done.wait [#allocation9], 768  }
  0x5a   :  { %4136 = vsyncadd [#allocation9], 4294966528  ;;  %v4148_v0 = vmov 0.0|0.0   ;;  %vm4149_vm0 = vmmov 0   ;;  %v4150_v1 = vmov 0.0   ;;  %v102_v2 = vld [vmem:[#allocation7] sm:$0xff] }
  0x5b   :  { %3645 = vmatprep.subr.bf16.mxu1 %v4148_v0  ;;  %3642 = vmatprep.subr.bf16.mxu0 %v4148_v0  ;;  %v103_v3 = vld [vmem:[#allocation7 + $0x8] sm:$0xff]  ;;  %v117_v4 = vld [vmem:[#allocation5] sm:$0xff]  ;;  %v118_v6 = vld [vmem:[#allocation5 + $0x8] sm:$0xff]  ;;  %vm126_vm1 = vcmask 130048   ;;  %s4151_s24 = smov 32   ;;  %vm200_vm2 = vcmask 261120  }
  0x5c   :  { %3351 = vmatprep.mubr.msk.f32.mxu0 %vm4149_vm0, %v4150_v1  ;;  %3362 = vmatprep.mubr.msk.f32.mxu1 %vm4149_vm0, %v4150_v1  ;;  %v4292_v5 = vpack.c.bf16 %v103_v3, %v102_v2  ;;  %v104_v7 = vld [vmem:[#allocation7 + $0x10] sm:$0xff]  ;;  %v3643_v8 = vpack.c.bf16 %v118_v6, %v117_v4  ;;  %v105_v9 = vld [vmem:[#allocation7 + $0x18] sm:$0xff]  ;;  %v116_v11 = vld [vmem:[#allocation2] sm:$0xff]  ;;  %s4153_s19 = smov 112   ;;  %s4154_s21 = smov 80   ;;  %vm3095_vm3 = vcmask 1040384  }
  0x5d   :  { %v4295_v10 = vpack.c.bf16 %v105_v9, %v104_v7  ;;  %v3168_v12 = vld [vmem:[%s4771_s3] ss:$0 sm:$0xff]  ;;  %v110_v29 = vld [vmem:[#allocation8] sm:$0xff]  ;;  %v111_v30 = vld [vmem:[#allocation8 + $0x8] sm:$0xff]  ;;  %s4152_s3 = smov 64   ;;  %s4155_s0 = smov 16  }
  0x5e   :  { %3647 = vmatpush3.bf16.msra.mxu1 %v4292_v5  ;;  %3644 = vmatpush3.bf16.msra.mxu0 %v3643_v8  ;;  %v112_v31 = vld [vmem:[#allocation8 + $0x10] sm:$0xff]  ;;  %v4318_v32 = vpack.c.bf16 %v111_v30, %v110_v29  ;;  %v113_v33 = vld [vmem:[#allocation8 + $0x18] sm:$0xff]  ;;  %v109_v51 = vld [vmem:[%s4774_s6 + $0x8] sm:$0xff]  ;;  %s4156_s30 = smov 96   ;;  %vm3097_vm4 = vcmask 1041408   ;;  %vm3099_vm5 = vcmask 1042432  }
  0x5f   :  { %3648 = vmatprep.subr.bf16.mxu1 %v4148_v0  ;;  %3651 = vmatprep.subr.bf16.mxu0 %v4148_v0  ;;  %v4321_v34 = vpack.c.bf16 %v113_v33, %v112_v31  ;;  %v4341_v39 = vld [vmem:[%s4773_s5] sm:$0x1]  ;;  %v106_v62 = vld [vmem:[#allocation10] sm:$0xff]  ;;  %v107_v63 = vld [vmem:[#allocation10 + $0x8] sm:$0xff]  ;;  %vm3101_vm6 = vcmask 1043456   ;;  %vm3103_vm7 = vcmask 1044480  }
  0x60   :  { %v108_v50 = vld [vmem:[%s4774_s6] sm:$0xff]  ;;  %v4363_v3 = vpack.c.bf16 %v107_v63, %v106_v62  ;;  %vm3105_vm8 = vcmask 1045504   ;;  %vm3107_vm9 = vcmask 1046528  }
  0x61   :  { %3352 = vmatmul.mubr.msk.f32.vlgmr.msra.gmra.mrb[0].mxu0 %vm126_vm1, %v116_v11  ;;  %v4354_v52 = vpack.c.bf16 %v109_v51, %v108_v50 }
  0x62   :  { %3650 = vmatpush3.bf16.msra.mxu1 %v4295_v10  ;;  %3373 = vmatprep.mubr.msk.f32.mxu0 %vm4149_vm0, %v4150_v1 }
  0x63   :  { %3657 = vmatprep.subr.bf16.mxu1 %v4148_v0  ;;  %3653 = vmatpush3.bf16.msra.mxu0 %v4318_v32 }
  0x64   :  { %3654 = vmatprep.subr.bf16.mxu0 %v4148_v0 }
  0x65   :  { %3363 = vmatmul.mubr.f32.vlgmr.msra.gmra.mrb[0].mxu1 %v4150_v1 }
  0x66   :  { %3380 = vmatprep.mubr.msk.f32.mxu1 %vm4149_vm0, %v4150_v1  ;;  %3659 = vmatpush3.bf16.msra.mxu1 %v4354_v52 }
  0x67   :  { %3656 = vmatpush3.bf16.msra.mxu0 %v4321_v34  ;;  %3660 = vmatprep.subr.bf16.mxu1 %v4148_v0 }
  0x68   :  { %3663 = vmatprep.subr.bf16.mxu0 %v4148_v0 }
 0x134   :  { %v196_v13 = vpop.f32.mrb[0].mxu0 }
 0x135   :  { %v4310_v14 = vadd.f32 %v3168_v12, %v196_v13  ;;  %v3353_v15 = vpop.f32.mrb[1].mxu0  ;;  %v4386_v12 = vld [vmem:[%s4776_s8] sm:$0x1] }
 0x138   :  { %v270_v16 = vpop.f32.mrb[0].mxu1 }
 0x139   :  { %v274_v17 = vadd.f32 %v270_v16, %v4310_v14  ;;  %v3364_v18 = vpop.f32.mrb[1].mxu1 }
 0x13b   :  { %3831 = vtanh.f32 %v274_v17  ;;  %v3170_v20 = vmul.f32 -1.442695, %v274_v17 }
 0x13d   :  { %3833 = vpow2.f32 %v3170_v20 }
 0x145   :  { %v3832_v19 = vpop.eup %3831 }
 0x146   :  { %284 = vrot.lane.b32.xlu0 %v3832_v19, %s4151_s24 }
 0x147   :  { %v3834_v21 = vpop.eup %3833 }
 0x148   :  { %v278_v22 = vadd.f32 1.0, %v3834_v21 }
 0x14a   :  { %3835 = vrcp.f32 %v278_v22 }
 0x154   :  { %v3836_v23 = vpop.eup %3835 }
 0x155   :  { %v282_v26 = vmul.f32 0.0, %v3836_v23 }
 0x1b8   :  { %v285_v24 = vpop.permute.xlu0 %284 }
 0x1b9   :  { %v287_v25 = vmul.f32 %v3836_v23, %v285_v24 }
 0x1bb   :  { %289 = vrot.lane.b32.xlu0 %v287_v25, %s4151_s24 }
 0x22d   :  { %v290_v27 = vpop.permute.xlu0 %289 }
 0x22e   :  { %v4315_v28 = vadd.f32 %v290_v27, %v282_v26 }
 0x230   :  { %3837 = vtanh.f32 %v4315_v28  ;;  %v636_v6 = vrot.slane %v4315_v28, 7 }
 0x23a   :  { %v3838_v35 = vpop.eup %3837 }
 0x23b   :  { %295 = vrot.lane.b32.xlu1 %v3838_v35, %s4151_s24 }
 0x2ad   :  { %v296_v36 = vpop.permute.xlu1 %295 }
 0x2ae   :  { %v298_v37 = vmul.f32 %v3836_v23, %v296_v36 }
 0x2b0   :  { %300 = vrot.lane.b32.xlu1 %v298_v37, %s4152_s3 }
 0x322   :  { %v301_v38 = vpop.permute.xlu1 %300 }
 0x323   :  { %3374 = vmatmul.mubr.msk.f32.vlgmr.msra.gmra.mrb[2].mxu0 %vm200_vm2, %v301_v38 }
 0x324   :  { %3665 = vmatpush3.bf16.msra.mxu0 %v4292_v5  ;;  %3398 = vmatprep.mubr.msk.f32.mxu0 %vm4149_vm0, %v4150_v1 }
 0x325   :  { %3666 = vmatprep.subr.bf16.mxu0 %v4148_v0 }
 0x328   :  { %3668 = vmatpush3.bf16.msra.mxu0 %v4295_v10 }
 0x329   :  { %3675 = vmatprep.subr.bf16.mxu0 %v4148_v0 }
 0x32b   :  { %3399 = vmatmul.mubr.msk.f32.vlgmr.msra.gmra.mrb[4].mxu0 %vm200_vm2, %v301_v38 }
 0x32c   :  { %3416 = vmatprep.mubr.msk.f32.mxu0 %vm4149_vm0, %v4150_v1  ;;  %3677 = vmatpush3.bf16.msra.mxu0 %v4354_v52 }
 0x32d   :  { %3678 = vmatprep.subr.bf16.mxu0 %v4148_v0 }
 0x3f6   :  { %v370_v40 = vpop.f32.mrb[2].mxu0 }
 0x3f7   :  { %v371_v41 = vadd.f32 %v370_v40, %v4341_v39  ;;  %v3375_v42 = vpop.f32.mrb[3].mxu0 }
 0x3f9   :  { %v4344_v43 = vmax.f32 %v371_v41, 0.0 }
 0x3fb   :  { %v375_v44 = vmul.f32 0.5, %v4344_v43 }
 0x3fd   :  { %v376_v45 = vmul.f32 1.442695, %v375_v44 }
 0x3fe   :  { %v620_v46 = vpop.f32.mrb[4].mxu0 }
 0x3ff   :  { %v625_v47 = vrot.slane %v620_v46, 7  ;;  %v3400_v48 = vpop.f32.mrb[5].mxu0  ;;  %3839 = vpow2.f32 %v376_v45 }
 0x401   :  { %v627_v49 = vadd.f32 %v625_v47, %v4310_v14 }
 0x403   :  { %3841 = vtanh.f32 %v627_v49  ;;  %v3175_v56 = vmul.f32 -1.442695, %v627_v49 }
 0x405   :  { %3843 = vpow2.f32 %v3175_v56 }
 0x409   :  { %v3840_v53 = vpop.eup %3839 }
 0x40a   :  { %v378_v55 = vmul.f32 1e-08, %v3840_v53 }
 0x40d   :  { %v3842_v54 = vpop.eup %3841 }
 0x40e   :  { %640 = vrot.lane.b32.xlu0 %v3842_v54, %s4151_s24 }
 0x40f   :  { %v3844_v57 = vpop.eup %3843 }
 0x410   :  { %v631_v58 = vadd.f32 1.0, %v3844_v57 }
 0x412   :  { %380 = vrot.lane.b32.xlu0 %v378_v55, %s4153_s19  ;;  %3845 = vrcp.f32 %v631_v58 }
 0x41c   :  { %v3846_v59 = vpop.eup %3845 }
 0x41d   :  { %v638_v7 = vmul.f32 %v3846_v59, %v636_v6 }
 0x480   :  { %v641_v60 = vpop.permute.xlu0 %640 }
 0x481   :  { %v643_v61 = vmul.f32 %v3846_v59, %v641_v60 }
 0x483   :  { %645 = vrot.lane.b32.xlu1 %v643_v61, %s4151_s24 }
 0x484   :  { %v381_v2 = vpop.permute.xlu0 %380 }
 0x485   :  { %v383_v4 = vadd.f32 %v381_v2, %v4344_v43 }
 0x487   :  { %3381 = vmatmul.mubr.msk.f32.vlgmr.msra.gmra.mrb[2].mxu1 %vm126_vm1, %v383_v4 }
 0x488   :  { %3662 = vmatpush3.bf16.msra.mxu1 %v4363_v3  ;;  %3387 = vmatprep.mubr.msk.f32.mxu1 %vm4149_vm0, %v4150_v1 }
 0x489   :  { %3669 = vmatprep.subr.bf16.mxu1 %v4148_v0 }
 0x48f   :  { %3388 = vmatmul.mubr.f32.vlgmr.msra.gmra.mrb[2].mxu1 %v4150_v1 }
 0x490   :  { %3671 = vmatpush3.bf16.msra.mxu1 %v4318_v32  ;;  %3409 = vmatprep.mubr.msk.f32.mxu1 %vm4149_vm0, %v4150_v1 }
 0x491   :  { %3672 = vmatprep.subr.bf16.mxu1 %v4148_v0 }
 0x494   :  { %3674 = vmatpush3.bf16.msra.mxu1 %v4321_v34 }
 0x495   :  { %3681 = vmatprep.subr.bf16.mxu1 %v4148_v0 }
 0x4f5   :  { %v646_v8 = vpop.permute.xlu1 %645 }
 0x4f6   :  { %v4379_v9 = vadd.f32 %v646_v8, %v638_v7 }
 0x4f8   :  { %3847 = vtanh.f32 %v4379_v9  ;;  %v996_v60 = vrot.slane %v4379_v9, 7 }
 0x502   :  { %v3848_v11 = vpop.eup %3847 }
 0x503   :  { %651 = vrot.lane.b32.xlu1 %v3848_v11, %s4151_s24 }
 0x562   :  { %v525_v13 = vpop.f32.mrb[2].mxu1 }
 0x563   :  { %v3789_v15 = vadd.f32 %v525_v13, %v4386_v12  ;;  %v3389_v16 = vpop.f32.mrb[3].mxu1 }
 0x565   :  { %3849 = vtanh.f32 %v3789_v15  ;;  %v3173_v21 = vmul.f32 -1.442695, %v3789_v15 }
 0x567   :  { %3851 = vpow2.f32 %v3173_v21 }
 0x56f   :  { %v3850_v17 = vpop.eup %3849 }
 0x570   :  { %539 = vrot.lane.b32.xlu1 %v3850_v17, %s4154_s21 }
 0x571   :  { %v3852_v22 = vpop.eup %3851 }
 0x572   :  { %v533_v23 = vadd.f32 1.0, %v3852_v22 }
 0x574   :  { %3853 = vrcp.f32 %v533_v23 }
 0x575   :  { %v652_v18 = vpop.permute.xlu1 %651 }
 0x576   :  { %v654_v19 = vmul.f32 %v3846_v59, %v652_v18 }
 0x578   :  { %v656_v20 = vrot.slane %v654_v19, 1 }
 0x57a   :  { %657 = vrot.lane.b32.xlu0 %v656_v20, %s4152_s3 }
 0x57e   :  { %v3854_v24 = vpop.eup %3853 }
 0x57f   :  { %v537_v28 = vmul.f32 0.0, %v3854_v24 }
 0x5e2   :  { %v540_v25 = vpop.permute.xlu1 %539 }
 0x5e3   :  { %v542_v26 = vmul.f32 %v3854_v24, %v540_v25 }
 0x5e5   :  { %544 = vrot.lane.b32.xlu0 %v542_v26, %s4155_s0 }
 0x5ec   :  { %v658_v27 = vpop.permute.xlu0 %657 }
 0x5ed   :  { %3410 = vmatmul.mubr.msk.f32.vlgmr.msra.gmra.mrb[4].mxu1 %vm200_vm2, %v658_v27 }
 0x5ee   :  { %3683 = vmatpush3.bf16.msra.mxu1 %v4292_v5  ;;  %3434 = vmatprep.mubr.msk.f32.mxu1 %vm4149_vm0, %v4150_v1 }
 0x5ef   :  { %3684 = vmatprep.subr.bf16.mxu1 %v4148_v0 }
 0x5f2   :  { %3686 = vmatpush3.bf16.msra.mxu1 %v4295_v10 }
 0x5f3   :  { %3693 = vmatprep.subr.bf16.mxu1 %v4148_v0 }
 0x5f5   :  { %3435 = vmatmul.mubr.msk.f32.vlgmr.msra.gmra.mrb[6].mxu1 %vm200_vm2, %v658_v27 }
 0x5f6   :  { %3695 = vmatpush3.bf16.msra.mxu1 %v4354_v52  ;;  %3452 = vmatprep.mubr.msk.f32.mxu1 %vm4149_vm0, %v4150_v1 }
 0x5f7   :  { %3696 = vmatprep.subr.bf16.mxu1 %v4148_v0 }
 0x657   :  { %v545_v29 = vpop.permute.xlu0 %544 }
 0x658   :  { %v4404_v30 = vadd.f32 %v545_v29, %v537_v28 }
 0x65a   :  { %3855 = vtanh.f32 %v4404_v30 }
 0x664   :  { %v3856_v31 = vpop.eup %3855 }
 0x665   :  { %550 = vrot.lane.b32.xlu0 %v3856_v31, %s4155_s0 }
 0x6c0   :  { %v727_v33 = vpop.f32.mrb[4].mxu1 }
 0x6c1   :  { %v728_v35 = vadd.f32 %v727_v33, %v4341_v39  ;;  %v3411_v36 = vpop.f32.mrb[5].mxu1 }
 0x6c3   :  { %v4409_v37 = vmax.f32 %v728_v35, 0.0 }
 0x6c5   :  { %v732_v38 = vmul.f32 0.5, %v4409_v37 }
 0x6c7   :  { %v733_v40 = vmul.f32 1.442695, %v732_v38 }
 0x6c8   :  { %v980_v41 = vpop.f32.mrb[6].mxu1 }
 0x6c9   :  { %3857 = vpow2.f32 %v733_v40  ;;  %v985_v42 = vrot.slane %v980_v41, 6  ;;  %v3436_v44 = vpop.f32.mrb[7].mxu1 }
 0x6cb   :  { %v987_v45 = vadd.f32 %v985_v42, %v4310_v14 }
 0x6cd   :  { %3859 = vtanh.f32 %v987_v45  ;;  %v3181_v49 = vmul.f32 -1.442695, %v987_v45 }
 0x6cf   :  { %3861 = vpow2.f32 %v3181_v49 }
 0x6d3   :  { %v3858_v46 = vpop.eup %3857 }
 0x6d4   :  { %v735_v47 = vmul.f32 1e-08, %v3858_v46 }
 0x6d6   :  { %737 = vrot.lane.b32.xlu0 %v735_v47, %s4153_s19 }
 0x6d7   :  { %v3860_v48 = vpop.eup %3859  ;;  %v551_v53 = vpop.permute.xlu0 %550 }
 0x6d8   :  { %1000 = vrot.lane.b32.xlu1 %v3860_v48, %s4151_s24  ;;  %v4422_v59 = vmul.f32 %v3854_v24, %v551_v53 }
 0x6d9   :  { %v3862_v50 = vpop.eup %3861 }
 0x6da   :  { %v991_v51 = vadd.f32 1.0, %v3862_v50 }
 0x6dc   :  { %3863 = vrcp.f32 %v991_v51 }
 0x6e6   :  { %v3864_v56 = vpop.eup %3863 }
 0x6e7   :  { %v998_v61 = vmul.f32 %v3864_v56, %v996_v60 }
 0x748   :  { %v738_v54 = vpop.permute.xlu0 %737 }
 0x749   :  { %v740_v55 = vadd.f32 %v738_v54, %v4409_v37 }
 0x74a   :  { %v1001_v57 = vpop.permute.xlu1 %1000 }
 0x74b   :  { %v1003_v58 = vmul.f32 %v3864_v56, %v1001_v57  ;;  %3417 = vmatmul.mubr.msk.f32.vlgmr.msra.gmra.mrb[6].mxu0 %vm126_vm1, %v740_v55 }
 0x74c   :  { %3680 = vmatpush3.bf16.msra.mxu0 %v4363_v3  ;;  %3423 = vmatprep.mubr.msk.f32.mxu0 %vm4149_vm0, %v4150_v1 }
 0x74d   :  { %1005 = vrot.lane.b32.xlu1 %v1003_v58, %s4151_s24  ;;  %3687 = vmatprep.subr.bf16.mxu0 %v4148_v0 }
 0x751   :  { %815 = vrot.lane.b32.xlu1 %v4422_v59, %s4156_s30 }
 0x7bf   :  { %v1006_v62 = vpop.permute.xlu1 %1005 }
 0x7c0   :  { %v4427_v63 = vadd.f32 %v1006_v62, %v998_v61 }
 0x7c2   :  { %3865 = vtanh.f32 %v4427_v63  ;;  %v1356_v57 = vrot.slane %v4427_v63, 7 }
 0x7c3   :  { %v816_v2 = vpop.permute.xlu1 %815 }
 0x7c4   :  { %3424 = vmatmul.mubr.msk.f32.vlgmr.msra.gmra.mrb[6].mxu0 %vm126_vm1, %v816_v2 }
 0x7c5   :  { %3689 = vmatpush3.bf16.msra.mxu0 %v4318_v32  ;;  %3445 = vmatprep.mubr.msk.f32.mxu0 %vm4149_vm0, %v4150_v1 }
 0x7c6   :  { %3690 = vmatprep.subr.bf16.mxu0 %v4148_v0 }
 0x7c9   :  { %3692 = vmatpush3.bf16.msra.mxu0 %v4321_v34 }
 0x7ca   :  { %3699 = vmatprep.subr.bf16.mxu0 %v4148_v0 }
 0x7cc   :  { %v3866_v4 = vpop.eup %3865 }
 0x7cd   :  { %1011 = vrot.lane.b32.xlu0 %v3866_v4, %s4151_s24 }
 0x83f   :  { %v1012_v6 = vpop.permute.xlu0 %1011 }
 0x840   :  { %v1014_v7 = vmul.f32 %v3864_v56, %v1012_v6 }
 0x842   :  { %v1016_v8 = vrot.slane %v1014_v7, 2 }
 0x844   :  { %1017 = vrot.lane.b32.xlu1 %v1016_v8, %s4152_s3 }
 0x897   :  { %v885_v9 = vpop.f32.mrb[6].mxu0 }
 0x898   :  { %v3790_v11 = vadd.f32 %v885_v9, %v4386_v12  ;;  %v3425_v13 = vpop.f32.mrb[7].mxu0 }
 0x89a   :  { %3867 = vtanh.f32 %v3790_v11  ;;  %v3179_v17 = vmul.f32 -1.442695, %v3790_v11 }
 0x89c   :  { %3869 = vpow2.f32 %v3179_v17 }
 0x8a4   :  { %v3868_v15 = vpop.eup %3867 }
 0x8a5   :  { %899 = vrot.lane.b32.xlu0 %v3868_v15, %s4154_s21 }
 0x8a6   :  { %v3870_v18 = vpop.eup %3869 }
 0x8a7   :  { %v893_v19 = vadd.f32 1.0, %v3870_v18 }
 0x8a9   :  { %3871 = vrcp.f32 %v893_v19 }
 0x8b3   :  { %v3872_v20 = vpop.eup %3871 }
 0x8b4   :  { %v897_v26 = vmul.f32 %v3872_v20, %v4404_v30 }
 0x8b6   :  { %v1018_v16 = vpop.permute.xlu1 %1017 }
 0x8b7   :  { %3446 = vmatmul.mubr.msk.f32.vlgmr.msra.gmra.mrb[8].mxu0 %vm200_vm2, %v1018_v16 }
 0x8b8   :  { %3701 = vmatpush3.bf16.msra.mxu0 %v4292_v5  ;;  %3470 = vmatprep.mubr.msk.f32.mxu0 %vm4149_vm0, %v4150_v1 }
 0x8b9   :  { %3702 = vmatprep.subr.bf16.mxu0 %v4148_v0 }
 0x8bc   :  { %3704 = vmatpush3.bf16.msra.mxu0 %v4295_v10 }
 0x8bd   :  { %3711 = vmatprep.subr.bf16.mxu0 %v4148_v0 }
 0x8bf   :  { %3471 = vmatmul.mubr.msk.f32.vlgmr.msra.gmra.mrb[10].mxu0 %vm200_vm2, %v1018_v16 }
 0x8c0   :  { %3713 = vmatpush3.bf16.msra.mxu0 %v4354_v52  ;;  %3488 = vmatprep.mubr.msk.f32.mxu0 %vm4149_vm0, %v4150_v1 }
 0x8c1   :  { %3714 = vmatprep.subr.bf16.mxu0 %v4148_v0 }
 0x917   :  { %v900_v21 = vpop.permute.xlu0 %899 }
 0x918   :  { %v902_v22 = vmul.f32 %v3872_v20, %v900_v21 }
 0x91a   :  { %904 = vrot.lane.b32.xlu1 %v902_v22, %s4155_s0 }
 0x98a   :  { %v1087_v23 = vpop.f32.mrb[8].mxu0 }
 0x98b   :  { %v1088_v24 = vadd.f32 %v1087_v23, %v4341_v39  ;;  %v3447_v25 = vpop.f32.mrb[9].mxu0 }
 0x98c   :  { %v905_v27 = vpop.permute.xlu1 %904 }
 0x98d   :  { %v4456_v28 = vmax.f32 %v1088_v24, 0.0  ;;  %v4458_v29 = vadd.f32 %v905_v27, %v897_v26 }
 0x98f   :  { %v1092_v31 = vmul.f32 0.5, %v4456_v28  ;;  %3873 = vtanh.f32 %v4458_v29 }
 0x991   :  { %v1093_v33 = vmul.f32 1.442695, %v1092_v31 }
 0x992   :  { %v1340_v35 = vpop.f32.mrb[10].mxu0 }
 0x993   :  { %v1345_v36 = vrot.slane %v1340_v35, 5  ;;  %v3472_v38 = vpop.f32.mrb[11].mxu0  ;;  %3875 = vpow2.f32 %v1093_v33 }
 0x995   :  { %v1347_v40 = vadd.f32 %v1345_v36, %v4310_v14 }
 0x997   :  { %3877 = vtanh.f32 %v1347_v40  ;;  %v3187_v45 = vmul.f32 -1.442695, %v1347_v40 }
 0x999   :  { %v3874_v41 = vpop.eup %3873  ;;  %3879 = vpow2.f32 %v3187_v45 }
 0x99a   :  { %910 = vrot.lane.b32.xlu1 %v3874_v41, %s4155_s0 }
 0x99d   :  { %v3876_v30 = vpop.eup %3875 }
 0x99e   :  { %v1095_v44 = vmul.f32 1e-08, %v3876_v30 }
 0x9a1   :  { %v3878_v42 = vpop.eup %3877 }
 0x9a2   :  { %1360 = vrot.lane.b32.xlu0 %v3878_v42, %s4151_s24 }
 0x9a3   :  { %v3880_v46 = vpop.eup %3879 }
 0x9a4   :  { %v1351_v47 = vadd.f32 1.0, %v3880_v46 }
 0x9a6   :  { %1097 = vrot.lane.b32.xlu0 %v1095_v44, %s4153_s19  ;;  %3881 = vrcp.f32 %v1351_v47 }
 0x9b0   :  { %v3882_v50 = vpop.eup %3881 }
 0x9b1   :  { %v1358_v58 = vmul.f32 %v3882_v50, %v1356_v57 }
 0xa0c   :  { %v911_v48 = vpop.permute.xlu1 %910 }
 0xa0d   :  { %v4466_v49 = vmul.f32 %v3872_v20, %v911_v48 }
 0xa0f   :  { %1175 = vrot.lane.b32.xlu0 %v4466_v49, %s4156_s30  ;;  %v3110_v44 = vrot.slane %v4466_v49, 7 }
 0xa14   :  { %v1361_v51 = vpop.permute.xlu0 %1360 }
 0xa15   :  { %v1363_v53 = vmul.f32 %v3882_v50, %v1361_v51 }
 0xa17   :  { %1365 = vrot.lane.b32.xlu1 %v1363_v53, %s4151_s24 }
 0xa18   :  { %v1098_v54 = vpop.permute.xlu0 %1097 }
 0xa19   :  { %v1100_v55 = vadd.f32 %v1098_v54, %v4456_v28 }
 0xa1b   :  { %3453 = vmatmul.mubr.msk.f32.vlgmr.msra.gmra.mrb[8].mxu1 %vm126_vm1, %v1100_v55 }
 0xa1c   :  { %3698 = vmatpush3.bf16.msra.mxu1 %v4363_v3  ;;  %3459 = vmatprep.mubr.msk.f32.mxu1 %vm4149_vm0, %v4150_v1 }
 0xa1d   :  { %3705 = vmatprep.subr.bf16.mxu1 %v4148_v0 }
 0xa81   :  { %v1176_v56 = vpop.permute.xlu0 %1175 }
 0xa82   :  { %3460 = vmatmul.mubr.msk.f32.vlgmr.msra.gmra.mrb[8].mxu1 %vm126_vm1, %v1176_v56 }
 0xa83   :  { %3707 = vmatpush3.bf16.msra.mxu1 %v4318_v32  ;;  %3481 = vmatprep.mubr.msk.f32.mxu1 %vm4149_vm0, %v4150_v1 }
 0xa84   :  { %3708 = vmatprep.subr.bf16.mxu1 %v4148_v0 }
 0xa87   :  { %3710 = vmatpush3.bf16.msra.mxu1 %v4321_v34 }
 0xa88   :  { %3717 = vmatprep.subr.bf16.mxu1 %v4148_v0 }
 0xa89   :  { %v1366_v60 = vpop.permute.xlu1 %1365 }
 0xa8a   :  { %v4485_v61 = vadd.f32 %v1366_v60, %v1358_v58 }
 0xa8c   :  { %3883 = vtanh.f32 %v4485_v61  ;;  %v1716_v58 = vrot.slane %v4485_v61, 7 }
 0xa96   :  { %v3884_v62 = vpop.eup %3883 }
 0xa97   :  { %1371 = vrot.lane.b32.xlu1 %v3884_v62, %s4151_s24 }
 0xb09   :  { %v1372_v2 = vpop.permute.xlu1 %1371 }
 0xb0a   :  { %v1374_v4 = vmul.f32 %v3882_v50, %v1372_v2  ;;  %v3125_v50 = vsel %vm3095_vm3, %v4422_v59, %v3110_v44 }
 0xb0c   :  { %v1376_v6 = vrot.slane %v1374_v4, 3 }
 0xb0e   :  { %1377 = vrot.lane.b32.xlu0 %v1376_v6, %s4152_s3 }
 0xb55   :  { %v1245_v7 = vpop.f32.mrb[8].mxu1 }
 0xb56   :  { %v3791_v63 = vadd.f32 %v1245_v7, %v4386_v12  ;;  %v3461_v8 = vpop.f32.mrb[9].mxu1 }
 0xb58   :  { %3885 = vtanh.f32 %v3791_v63  ;;  %v3185_v13 = vmul.f32 -1.442695, %v3791_v63 }
 0xb5a   :  { %3887 = vpow2.f32 %v3185_v13 }
 0xb62   :  { %v3886_v9 = vpop.eup %3885 }
 0xb63   :  { %1259 = vrot.lane.b32.xlu1 %v3886_v9, %s4154_s21 }
 0xb64   :  { %v3888_v15 = vpop.eup %3887 }
 0xb65   :  { %v1253_v16 = vadd.f32 1.0, %v3888_v15 }
 0xb67   :  { %3889 = vrcp.f32 %v1253_v16 }
 0xb71   :  { %v3890_v17 = vpop.eup %3889 }
 0xb72   :  { %v1257_v20 = vmul.f32 %v3890_v17, %v4458_v29 }
 0xb80   :  { %v1378_v11 = vpop.permute.xlu0 %1377 }
 0xb81   :  { %3482 = vmatmul.mubr.msk.f32.vlgmr.msra.gmra.mrb[10].mxu1 %vm200_vm2, %v1378_v11 }
 0xb82   :  { %3719 = vmatpush3.bf16.msra.mxu1 %v4292_v5  ;;  %3506 = vmatprep.mubr.msk.f32.mxu1 %vm4149_vm0, %v4150_v1 }
 0xb83   :  { %3720 = vmatprep.subr.bf16.mxu1 %v4148_v0 }
 0xb86   :  { %3722 = vmatpush3.bf16.msra.mxu1 %v4295_v10 }
 0xb87   :  { %3729 = vmatprep.subr.bf16.mxu1 %v4148_v0 }
 0xb89   :  { %3507 = vmatmul.mubr.msk.f32.vlgmr.msra.gmra.mrb[12].mxu1 %vm200_vm2, %v1378_v11 }
 0xb8a   :  { %3731 = vmatpush3.bf16.msra.mxu1 %v4354_v52  ;;  %3524 = vmatprep.mubr.msk.f32.mxu1 %vm4149_vm0, %v4150_v1 }
 0xb8b   :  { %3732 = vmatprep.subr.bf16.mxu1 %v4148_v0 }
 0xbd5   :  { %v1260_v18 = vpop.permute.xlu1 %1259 }
 0xbd6   :  { %v1262_v19 = vmul.f32 %v3890_v17, %v1260_v18 }
 0xbd8   :  { %1264 = vrot.lane.b32.xlu0 %v1262_v19, %s4155_s0 }
 0xc4a   :  { %v1265_v21 = vpop.permute.xlu0 %1264 }
 0xc4b   :  { %v4506_v22 = vadd.f32 %v1265_v21, %v1257_v20 }
 0xc4d   :  { %3891 = vtanh.f32 %v4506_v22 }
 0xc54   :  { %v1447_v23 = vpop.f32.mrb[10].mxu1 }
 0xc55   :  { %v1448_v24 = vadd.f32 %v1447_v23, %v4341_v39  ;;  %v3483_v25 = vpop.f32.mrb[11].mxu1 }
 0xc57   :  { %v3892_v26 = vpop.eup %3891  ;;  %v4510_v27 = vmax.f32 %v1448_v24, 0.0 }
 0xc58   :  { %1270 = vrot.lane.b32.xlu1 %v3892_v26, %s4155_s0 }
 0xc59   :  { %v1452_v31 = vmul.f32 0.5, %v4510_v27 }
 0xc5b   :  { %v1453_v33 = vmul.f32 1.442695, %v1452_v31 }
 0xc5c   :  { %v1700_v35 = vpop.f32.mrb[12].mxu1 }
 0xc5d   :  { %3893 = vpow2.f32 %v1453_v33  ;;  %v1705_v29 = vrot.slane %v1700_v35, 4  ;;  %v3508_v36 = vpop.f32.mrb[13].mxu1 }
 0xc5f   :  { %v1707_v38 = vadd.f32 %v1705_v29, %v4310_v14 }
 0xc61   :  { %3895 = vtanh.f32 %v1707_v38  ;;  %v3193_v42 = vmul.f32 -1.442695, %v1707_v38 }
 0xc63   :  { %3897 = vpow2.f32 %v3193_v42 }
 0xc67   :  { %v3894_v40 = vpop.eup %3893 }
 0xc68   :  { %v1455_v41 = vmul.f32 1e-08, %v3894_v40 }
 0xc6a   :  { %1457 = vrot.lane.b32.xlu1 %v1455_v41, %s4153_s19 }
 0xc6b   :  { %v3896_v30 = vpop.eup %3895 }
 0xc6c   :  { %1720 = vrot.lane.b32.xlu0 %v3896_v30, %s4151_s24 }
 0xc6d   :  { %v3898_v47 = vpop.eup %3897 }
 0xc6e   :  { %v1711_v53 = vadd.f32 1.0, %v3898_v47 }
 0xc70   :  { %3899 = vrcp.f32 %v1711_v53 }
 0xc7a   :  { %v3900_v49 = vpop.eup %3899 }
 0xc7b   :  { %v1718_v60 = vmul.f32 %v3900_v49, %v1716_v58 }
 0xcca   :  { %v1271_v45 = vpop.permute.xlu1 %1270 }
 0xccb   :  { %v1273_v46 = vmul.f32 %v3890_v17, %v1271_v45 }
 0xccd   :  { %v3112_v48 = vrot.slane %v1273_v46, 6  ;;  %1535 = vrot.lane.b32.xlu0 %v1273_v46, %s4156_s30 }
 0xccf   :  { %v4522_v51 = vsel %vm3097_vm4, %v3125_v50, %v3112_v48 }
 0xcdc   :  { %v1458_v54 = vpop.permute.xlu1 %1457 }
 0xcdd   :  { %v1460_v55 = vadd.f32 %v1458_v54, %v4510_v27 }
 0xcde   :  { %v1721_v56 = vpop.permute.xlu0 %1720 }
 0xcdf   :  { %v1723_v57 = vmul.f32 %v3900_v49, %v1721_v56  ;;  %3489 = vmatmul.mubr.msk.f32.vlgmr.msra.gmra.mrb[12].mxu0 %vm126_vm1, %v1460_v55 }
 0xce0   :  { %3716 = vmatpush3.bf16.msra.mxu0 %v4363_v3  ;;  %3495 = vmatprep.mubr.msk.f32.mxu0 %vm4149_vm0, %v4150_v1 }
 0xce1   :  { %1725 = vrot.lane.b32.xlu1 %v1723_v57, %s4151_s24  ;;  %3723 = vmatprep.subr.bf16.mxu0 %v4148_v0 }
 0xd3f   :  { %v1536_v59 = vpop.permute.xlu0 %1535 }
 0xd40   :  { %3496 = vmatmul.mubr.msk.f32.vlgmr.msra.gmra.mrb[12].mxu0 %vm126_vm1, %v1536_v59 }
 0xd41   :  { %3725 = vmatpush3.bf16.msra.mxu0 %v4318_v32  ;;  %3517 = vmatprep.mubr.msk.f32.mxu0 %vm4149_vm0, %v4150_v1 }
 0xd42   :  { %3726 = vmatprep.subr.bf16.mxu0 %v4148_v0 }
 0xd45   :  { %3728 = vmatpush3.bf16.msra.mxu0 %v4321_v34 }
 0xd46   :  { %3735 = vmatprep.subr.bf16.mxu0 %v4148_v0 }
 0xd53   :  { %v1726_v62 = vpop.permute.xlu1 %1725 }
 0xd54   :  { %v4539_v2 = vadd.f32 %v1726_v62, %v1718_v60 }
 0xd56   :  { %3901 = vtanh.f32 %v4539_v2  ;;  %v2076_v58 = vrot.slane %v4539_v2, 7 }
 0xd60   :  { %v3902_v4 = vpop.eup %3901 }
 0xd61   :  { %1731 = vrot.lane.b32.xlu0 %v3902_v4, %s4151_s24 }
 0xdd3   :  { %v1732_v6 = vpop.permute.xlu0 %1731 }
 0xdd4   :  { %v1734_v7 = vmul.f32 %v3900_v49, %v1732_v6 }
 0xdd6   :  { %v1736_v63 = vrot.slane %v1734_v7, 4 }
 0xdd8   :  { %1737 = vrot.lane.b32.xlu1 %v1736_v63, %s4152_s3 }
 0xe13   :  { %v1605_v8 = vpop.f32.mrb[12].mxu0 }
 0xe14   :  { %v3792_v9 = vadd.f32 %v1605_v8, %v4386_v12  ;;  %v3497_v11 = vpop.f32.mrb[13].mxu0 }
 0xe16   :  { %3903 = vtanh.f32 %v3792_v9  ;;  %v3191_v15 = vmul.f32 -1.442695, %v3792_v9 }
 0xe18   :  { %3905 = vpow2.f32 %v3191_v15 }
 0xe20   :  { %v3904_v61 = vpop.eup %3903 }
 0xe21   :  { %1619 = vrot.lane.b32.xlu0 %v3904_v61, %s4154_s21 }
 0xe22   :  { %v3906_v16 = vpop.eup %3905 }
 0xe23   :  { %v1613_v17 = vadd.f32 1.0, %v3906_v16 }
 0xe25   :  { %3907 = vrcp.f32 %v1613_v17 }
 0xe2f   :  { %v3908_v18 = vpop.eup %3907 }
 0xe30   :  { %v1617_v21 = vmul.f32 %v3908_v18, %v4506_v22 }
 0xe4a   :  { %v1738_v13 = vpop.permute.xlu1 %1737 }
 0xe4b   :  { %3518 = vmatmul.mubr.msk.f32.vlgmr.msra.gmra.mrb[14].mxu0 %vm200_vm2, %v1738_v13 }
 0xe4c   :  { %3737 = vmatpush3.bf16.msra.mxu0 %v4292_v5  ;;  %3542 = vmatprep.mubr.msk.f32.mxu0 %vm4149_vm0, %v4150_v1 }
 0xe4d   :  { %3738 = vmatprep.subr.bf16.mxu0 %v4148_v0 }
 0xe50   :  { %3740 = vmatpush3.bf16.msra.mxu0 %v4295_v10 }
 0xe51   :  { %3747 = vmatprep.subr.bf16.mxu0 %v4148_v0 }
 0xe53   :  { %3543 = vmatmul.mubr.msk.f32.vlgmr.msra.gmra.mrb[16].mxu0 %vm200_vm2, %v1738_v13 }
 0xe54   :  { %3749 = vmatpush3.bf16.msra.mxu0 %v4354_v52  ;;  %3560 = vmatprep.mubr.msk.f32.mxu0 %vm4149_vm0, %v4150_v1 }
 0xe55   :  { %3750 = vmatprep.subr.bf16.mxu0 %v4148_v0 }
 0xe93   :  { %v1620_v19 = vpop.permute.xlu0 %1619 }
 0xe94   :  { %v1622_v20 = vmul.f32 %v3908_v18, %v1620_v19 }
 0xe96   :  { %1624 = vrot.lane.b32.xlu1 %v1622_v20, %s4155_s0 }
 0xf08   :  { %v1625_v23 = vpop.permute.xlu1 %1624 }
 0xf09   :  { %v4560_v24 = vadd.f32 %v1625_v23, %v1617_v21 }
 0xf0b   :  { %3909 = vtanh.f32 %v4560_v24 }
 0xf15   :  { %v3910_v25 = vpop.eup %3909 }
 0xf16   :  { %1630 = vrot.lane.b32.xlu0 %v3910_v25, %s4155_s0 }
 0xf1e   :  { %v1807_v26 = vpop.f32.mrb[14].mxu0 }
 0xf1f   :  { %v1808_v31 = vadd.f32 %v1807_v26, %v4341_v39  ;;  %v3519_v33 = vpop.f32.mrb[15].mxu0 }
 0xf21   :  { %v4565_v35 = vmax.f32 %v1808_v31, 0.0 }
 0xf23   :  { %v1812_v29 = vmul.f32 0.5, %v4565_v35 }
 0xf25   :  { %v1813_v36 = vmul.f32 1.442695, %v1812_v29 }
 0xf26   :  { %v2060_v38 = vpop.f32.mrb[16].mxu0 }
 0xf27   :  { %3911 = vpow2.f32 %v1813_v36  ;;  %v2065_v22 = vrot.slane %v2060_v38, 3  ;;  %v3544_v40 = vpop.f32.mrb[17].mxu0 }
 0xf29   :  { %v2067_v41 = vadd.f32 %v2065_v22, %v4310_v14 }
 0xf2b   :  { %3913 = vtanh.f32 %v2067_v41  ;;  %v3199_v46 = vmul.f32 -1.442695, %v2067_v41 }
 0xf2d   :  { %3915 = vpow2.f32 %v3199_v46 }
 0xf31   :  { %v3912_v30 = vpop.eup %3911 }
 0xf32   :  { %v1815_v42 = vmul.f32 1e-08, %v3912_v30 }
 0xf34   :  { %1817 = vrot.lane.b32.xlu0 %v1815_v42, %s4153_s19 }
 0xf35   :  { %v3914_v44 = vpop.eup %3913 }
 0xf36   :  { %2080 = vrot.lane.b32.xlu1 %v3914_v44, %s4151_s24 }
 0xf37   :  { %v3916_v53 = vpop.eup %3915 }
 0xf38   :  { %v2071_v54 = vadd.f32 1.0, %v3916_v53 }
 0xf3a   :  { %3917 = vrcp.f32 %v2071_v54 }
 0xf44   :  { %v3918_v56 = vpop.eup %3917 }
 0xf45   :  { %v2078_v60 = vmul.f32 %v3918_v56, %v2076_v58 }
 0xf88   :  { %v1631_v45 = vpop.permute.xlu0 %1630 }
 0xf89   :  { %v1633_v47 = vmul.f32 %v3908_v18, %v1631_v45 }
 0xf8b   :  { %v3114_v48 = vrot.slane %v1633_v47, 5  ;;  %1895 = vrot.lane.b32.xlu1 %v1633_v47, %s4156_s30 }
 0xf8d   :  { %v4574_v50 = vsel %vm3099_vm5, %v4522_v51, %v3114_v48 }
 0xfa6   :  { %v1818_v55 = vpop.permute.xlu0 %1817 }
 0xfa7   :  { %v1820_v49 = vadd.f32 %v1818_v55, %v4565_v35 }
 0xfa8   :  { %v2081_v57 = vpop.permute.xlu1 %2080 }
 0xfa9   :  { %v2083_v59 = vmul.f32 %v3918_v56, %v2081_v57  ;;  %3525 = vmatmul.mubr.msk.f32.vlgmr.msra.gmra.mrb[14].mxu1 %vm126_vm1, %v1820_v49 }
 0xfaa   :  { %3734 = vmatpush3.bf16.msra.mxu1 %v4363_v3  ;;  %3531 = vmatprep.mubr.msk.f32.mxu1 %vm4149_vm0, %v4150_v1 }
 0xfab   :  { %2085 = vrot.lane.b32.xlu0 %v2083_v59, %s4151_s24  ;;  %3741 = vmatprep.subr.bf16.mxu1 %v4148_v0 }
 0xffd   :  { %v1896_v51 = vpop.permute.xlu1 %1895 }
 0xffe   :  { %3532 = vmatmul.mubr.msk.f32.vlgmr.msra.gmra.mrb[14].mxu1 %vm126_vm1, %v1896_v51 }
 0xfff   :  { %3743 = vmatpush3.bf16.msra.mxu1 %v4318_v32  ;;  %3553 = vmatprep.mubr.msk.f32.mxu1 %vm4149_vm0, %v4150_v1 }
0x1000   :  { %3744 = vmatprep.subr.bf16.mxu1 %v4148_v0 }
0x1003   :  { %3746 = vmatpush3.bf16.msra.mxu1 %v4321_v34 }
0x1004   :  { %3753 = vmatprep.subr.bf16.mxu1 %v4148_v0 }
0x101d   :  { %v2086_v62 = vpop.permute.xlu0 %2085 }
0x101e   :  { %v4591_v4 = vadd.f32 %v2086_v62, %v2078_v60 }
0x1020   :  { %3919 = vtanh.f32 %v4591_v4  ;;  %v2436_v58 = vrot.slane %v4591_v4, 7 }
0x102a   :  { %v3920_v6 = vpop.eup %3919 }
0x102b   :  { %2091 = vrot.lane.b32.xlu1 %v3920_v6, %s4151_s24 }
0x109d   :  { %v2092_v7 = vpop.permute.xlu1 %2091 }
0x109e   :  { %v2094_v63 = vmul.f32 %v3918_v56, %v2092_v7 }
0x10a0   :  { %v2096_v8 = vrot.slane %v2094_v63, 5 }
0x10a2   :  { %2097 = vrot.lane.b32.xlu0 %v2096_v8, %s4152_s3 }
0x10d1   :  { %v1965_v9 = vpop.f32.mrb[14].mxu1 }
0x10d2   :  { %v3793_v11 = vadd.f32 %v1965_v9, %v4386_v12  ;;  %v3533_v61 = vpop.f32.mrb[15].mxu1 }
0x10d4   :  { %3921 = vtanh.f32 %v3793_v11  ;;  %v3197_v15 = vmul.f32 -1.442695, %v3793_v11 }
0x10d6   :  { %3923 = vpow2.f32 %v3197_v15 }
0x10de   :  { %v3922_v2 = vpop.eup %3921 }
0x10df   :  { %1979 = vrot.lane.b32.xlu1 %v3922_v2, %s4154_s21 }
0x10e0   :  { %v3924_v16 = vpop.eup %3923 }
0x10e1   :  { %v1973_v17 = vadd.f32 1.0, %v3924_v16 }
0x10e3   :  { %3925 = vrcp.f32 %v1973_v17 }
0x10ed   :  { %v3926_v18 = vpop.eup %3925 }
0x10ee   :  { %v1977_v21 = vmul.f32 %v3926_v18, %v4560_v24 }
0x1114   :  { %v2098_v13 = vpop.permute.xlu0 %2097 }
0x1115   :  { %3554 = vmatmul.mubr.msk.f32.vlgmr.msra.gmra.mrb[16].mxu1 %vm200_vm2, %v2098_v13 }
0x1116   :  { %3755 = vmatpush3.bf16.msra.mxu1 %v4292_v5  ;;  %3578 = vmatprep.mubr.msk.f32.mxu1 %vm4149_vm0, %v4150_v1 }
0x1117   :  { %3756 = vmatprep.subr.bf16.mxu1 %v4148_v0 }
0x111a   :  { %3758 = vmatpush3.bf16.msra.mxu1 %v4295_v10 }
0x111b   :  { %3765 = vmatprep.subr.bf16.mxu1 %v4148_v0 }
0x111d   :  { %3579 = vmatmul.mubr.msk.f32.vlgmr.msra.gmra.mrb[18].mxu1 %vm200_vm2, %v2098_v13 }
0x111e   :  { %3767 = vmatpush3.bf16.msra.mxu1 %v4354_v52  ;;  %3596 = vmatprep.mubr.msk.f32.mxu1 %vm4149_vm0, %v4150_v1 }
0x111f   :  { %3768 = vmatprep.subr.bf16.mxu1 %v4148_v0 }
0x1151   :  { %v1980_v19 = vpop.permute.xlu1 %1979 }
0x1152   :  { %v1982_v20 = vmul.f32 %v3926_v18, %v1980_v19 }
0x1154   :  { %1984 = vrot.lane.b32.xlu0 %v1982_v20, %s4155_s0 }
0x11c6   :  { %v1985_v23 = vpop.permute.xlu0 %1984 }
0x11c7   :  { %v4612_v25 = vadd.f32 %v1985_v23, %v1977_v21  ;;  %v4671_v23 = vld [vmem:[%s4773_s5] sm:$0x1] }
0x11c9   :  { %3927 = vtanh.f32 %v4612_v25 }
0x11d3   :  { %v3928_v26 = vpop.eup %3927 }
0x11d4   :  { %1990 = vrot.lane.b32.xlu1 %v3928_v26, %s4155_s0 }
0x11e8   :  { %v2167_v31 = vpop.f32.mrb[16].mxu1 }
0x11e9   :  { %v2168_v33 = vadd.f32 %v2167_v31, %v4341_v39  ;;  %v3555_v29 = vpop.f32.mrb[17].mxu1 }
0x11eb   :  { %v4617_v36 = vmax.f32 %v2168_v33, 0.0 }
0x11ed   :  { %v2172_v38 = vmul.f32 0.5, %v4617_v36 }
0x11ef   :  { %v2173_v22 = vmul.f32 1.442695, %v2172_v38 }
0x11f0   :  { %v2420_v40 = vpop.f32.mrb[18].mxu1 }
0x11f1   :  { %3929 = vpow2.f32 %v2173_v22  ;;  %v2425_v24 = vrot.slane %v2420_v40, 2  ;;  %v3580_v41 = vpop.f32.mrb[19].mxu1 }
0x11f3   :  { %v2427_v30 = vadd.f32 %v2425_v24, %v4310_v14 }
0x11f5   :  { %3931 = vtanh.f32 %v2427_v30  ;;  %v3205_v53 = vmul.f32 -1.442695, %v2427_v30 }
0x11f7   :  { %3933 = vpow2.f32 %v3205_v53 }
0x11fb   :  { %v3930_v42 = vpop.eup %3929 }
0x11fc   :  { %v2175_v44 = vmul.f32 1e-08, %v3930_v42 }
0x11fe   :  { %2177 = vrot.lane.b32.xlu1 %v2175_v44, %s4153_s19 }
0x11ff   :  { %v3932_v45 = vpop.eup %3931 }
0x1200   :  { %2440 = vrot.lane.b32.xlu0 %v3932_v45, %s4151_s24 }
0x1201   :  { %v3934_v54 = vpop.eup %3933 }
0x1202   :  { %v2431_v55 = vadd.f32 1.0, %v3934_v54 }
0x1204   :  { %3935 = vrcp.f32 %v2431_v55 }
0x120e   :  { %v3936_v57 = vpop.eup %3935 }
0x120f   :  { %v2438_v60 = vmul.f32 %v3936_v57, %v2436_v58 }
0x1246   :  { %v1991_v39 = vpop.permute.xlu1 %1990 }
0x1247   :  { %v1993_v46 = vmul.f32 %v3926_v18, %v1991_v39 }
0x1249   :  { %v3116_v47 = vrot.slane %v1993_v46, 4  ;;  %2255 = vrot.lane.b32.xlu0 %v1993_v46, %s4156_s30 }
0x124b   :  { %v4626_v48 = vsel %vm3101_vm6, %v4574_v50, %v3116_v47 }
0x1270   :  { %v2178_v49 = vpop.permute.xlu1 %2177 }
0x1271   :  { %v2180_v56 = vadd.f32 %v2178_v49, %v4617_v36 }
0x1272   :  { %v2441_v59 = vpop.permute.xlu0 %2440 }
0x1273   :  { %v2443_v51 = vmul.f32 %v3936_v57, %v2441_v59  ;;  %3561 = vmatmul.mubr.msk.f32.vlgmr.msra.gmra.mrb[18].mxu0 %vm126_vm1, %v2180_v56 }
0x1274   :  { %3752 = vmatpush3.bf16.msra.mxu0 %v4363_v3  ;;  %3567 = vmatprep.mubr.msk.f32.mxu0 %vm4149_vm0, %v4150_v1 }
0x1275   :  { %2445 = vrot.lane.b32.xlu1 %v2443_v51, %s4151_s24  ;;  %3759 = vmatprep.subr.bf16.mxu0 %v4148_v0 }
0x12bb   :  { %v2256_v50 = vpop.permute.xlu0 %2255 }
0x12bc   :  { %3568 = vmatmul.mubr.msk.f32.vlgmr.msra.gmra.mrb[18].mxu0 %vm126_vm1, %v2256_v50 }
0x12bd   :  { %3761 = vmatpush3.bf16.msra.mxu0 %v4318_v32  ;;  %3589 = vmatprep.mubr.msk.f32.mxu0 %vm4149_vm0, %v4150_v1 }
0x12be   :  { %3762 = vmatprep.subr.bf16.mxu0 %v4148_v0 }
0x12c1   :  { %3764 = vmatpush3.bf16.msra.mxu0 %v4321_v34 }
0x12c2   :  { %3771 = vmatprep.subr.bf16.mxu0 %v4148_v0 }
0x12e7   :  { %v2446_v62 = vpop.permute.xlu1 %2445 }
0x12e8   :  { %v4643_v6 = vadd.f32 %v2446_v62, %v2438_v60 }
0x12ea   :  { %3937 = vtanh.f32 %v4643_v6  ;;  %v2796_v59 = vrot.slane %v4643_v6, 7 }
0x12f4   :  { %v3938_v7 = vpop.eup %3937 }
0x12f5   :  { %2451 = vrot.lane.b32.xlu0 %v3938_v7, %s4151_s24 }
0x1367   :  { %v2452_v63 = vpop.permute.xlu0 %2451 }
0x1368   :  { %v2454_v8 = vmul.f32 %v3936_v57, %v2452_v63 }
0x136a   :  { %v2456_v9 = vrot.slane %v2454_v8, 6 }
0x136c   :  { %2457 = vrot.lane.b32.xlu1 %v2456_v9, %s4152_s3 }
0x138f   :  { %v2325_v11 = vpop.f32.mrb[18].mxu0 }
0x1390   :  { %v3794_v61 = vadd.f32 %v2325_v11, %v4386_v12  ;;  %v3569_v2 = vpop.f32.mrb[19].mxu0 }
0x1392   :  { %3939 = vtanh.f32 %v3794_v61  ;;  %v3203_v12 = vmul.f32 -1.442695, %v3794_v61 }
0x1394   :  { %3941 = vpow2.f32 %v3203_v12 }
0x139c   :  { %v3940_v4 = vpop.eup %3939 }
0x139d   :  { %2339 = vrot.lane.b32.xlu0 %v3940_v4, %s4154_s21 }
0x13de   :  { %v2458_v13 = vpop.permute.xlu1 %2457 }
0x13df   :  { %3590 = vmatmul.mubr.msk.f32.vlgmr.msra.gmra.mrb[20].mxu0 %vm200_vm2, %v2458_v13 }
0x13e0   :  { %3773 = vmatpush3.bf16.msra.mxu0 %v4292_v5  ;;  %3614 = vmatprep.mubr.msk.f32.mxu0 %vm4149_vm0, %v4150_v1  ;;  %v3942_v5 = vpop.eup %3941 }
0x13e1   :  { %3774 = vmatprep.subr.bf16.mxu0 %v4148_v0  ;;  %v2333_v15 = vadd.f32 1.0, %v3942_v5 }
0x13e3   :  { %3943 = vrcp.f32 %v2333_v15 }
0x13e4   :  { %3776 = vmatpush3.bf16.msra.mxu0 %v4295_v10 }
0x13e5   :  { %3783 = vmatprep.subr.bf16.mxu0 %v4148_v0 }
0x13e7   :  { %3615 = vmatmul.mubr.msk.f32.vlgmr.msra.gmra.mrb[22].mxu0 %vm200_vm2, %v2458_v13 }
0x13e8   :  { %3785 = vmatpush3.bf16.msra.mxu0 %v4354_v52  ;;  %3632 = vmatprep.mubr.msk.f32.mxu0 %vm4149_vm0, %v4150_v1 }
0x13e9   :  { %3786 = vmatprep.subr.bf16.mxu0 %v4148_v0 }
0x13ed   :  { %v3944_v16 = vpop.eup %3943 }
0x13ee   :  { %v2337_v10 = vmul.f32 %v3944_v16, %v4612_v25 }
0x140f   :  { %v2340_v17 = vpop.permute.xlu0 %2339 }
0x1410   :  { %v2342_v18 = vmul.f32 %v3944_v16, %v2340_v17 }
0x1412   :  { %2344 = vrot.lane.b32.xlu1 %v2342_v18, %s4155_s0  ;;  %v3075_v18 = vrot.slane %v4409_v37, 7 }
0x1484   :  { %v2345_v19 = vpop.permute.xlu1 %2344 }
0x1485   :  { %v4664_v20 = vadd.f32 %v2345_v19, %v2337_v10  ;;  %v3078_v10 = vrot.slane %v4456_v28, 6  ;;  %v3081_v19 = vrot.slane %v4510_v27, 5 }
0x1487   :  { %3945 = vtanh.f32 %v4664_v20 }
0x1491   :  { %v3946_v52 = vpop.eup %3945 }
0x1492   :  { %2350 = vrot.lane.b32.xlu0 %v3946_v52, %s4155_s0  ;;  %v3084_v52 = vrot.slane %v4565_v35, 4 }
0x14b2   :  { %v2527_v21 = vpop.f32.mrb[20].mxu0 }
0x14b3   :  { %v2528_v26 = vadd.f32 %v4671_v23, %v2527_v21  ;;  %v3591_v31 = vpop.f32.mrb[21].mxu0 }
0x14b5   :  { %v4674_v33 = vmax.f32 %v2528_v26, 0.0  ;;  %v3096_v26 = vsel %vm3095_vm3, %v4344_v43, %v3075_v18 }
0x14b7   :  { %v2532_v25 = vmul.f32 0.5, %v4674_v33 }
0x14b9   :  { %v2533_v29 = vmul.f32 1.442695, %v2532_v25 }
0x14ba   :  { %v2780_v38 = vpop.f32.mrb[22].mxu0 }
0x14bb   :  { %3947 = vpow2.f32 %v2533_v29  ;;  %v2785_v22 = vrot.slane %v2780_v38, 1  ;;  %v3616_v40 = vpop.f32.mrb[23].mxu0  ;;  %v3098_v29 = vsel %vm3097_vm4, %v3096_v26, %v3078_v10  ;;  %v3090_v38 = vrot.slane %v4674_v33, 2 }
0x14bc   :  { %v3100_v37 = vsel %vm3099_vm5, %v3098_v29, %v3081_v19 }
0x14bd   :  { %v2787_v24 = vadd.f32 %v2785_v22, %v4310_v14  ;;  %v3102_v27 = vsel %vm3101_vm6, %v3100_v37, %v3084_v52 }
0x14bf   :  { %3949 = vtanh.f32 %v2787_v24  ;;  %v3211_v47 = vmul.f32 -1.442695, %v2787_v24 }
0x14c1   :  { %3951 = vpow2.f32 %v3211_v47 }
0x14c5   :  { %v3948_v41 = vpop.eup %3947 }
0x14c6   :  { %v2535_v30 = vmul.f32 1e-08, %v3948_v41 }
0x14c8   :  { %2537 = vrot.lane.b32.xlu0 %v2535_v30, %s4153_s19 }
0x14c9   :  { %v3950_v42 = vpop.eup %3949 }
0x14ca   :  { %2800 = vrot.lane.b32.xlu1 %v3950_v42, %s4151_s24 }
0x14cb   :  { %v3952_v14 = vpop.eup %3951 }
0x14cc   :  { %v2791_v53 = vadd.f32 1.0, %v3952_v14 }
0x14ce   :  { %3953 = vrcp.f32 %v2791_v53 }
0x14d8   :  { %v3954_v49 = vpop.eup %3953 }
0x14d9   :  { %v2798_v51 = vmul.f32 %v3954_v49, %v2796_v59 }
0x1504   :  { %v2351_v44 = vpop.permute.xlu0 %2350 }
0x1505   :  { %v2353_v45 = vmul.f32 %v3944_v16, %v2351_v44 }
0x1507   :  { %v3118_v39 = vrot.slane %v2353_v45, 3  ;;  %2615 = vrot.lane.b32.xlu1 %v2353_v45, %s4156_s30 }
0x1509   :  { %v4683_v46 = vsel %vm3103_vm7, %v4626_v48, %v3118_v39 }
0x153a   :  { %v2538_v54 = vpop.permute.xlu0 %2537 }
0x153b   :  { %v2540_v55 = vadd.f32 %v2538_v54, %v4674_v33 }
0x153c   :  { %v2801_v56 = vpop.permute.xlu1 %2800 }
0x153d   :  { %v2803_v57 = vmul.f32 %v3954_v49, %v2801_v56  ;;  %3597 = vmatmul.mubr.msk.f32.vlgmr.msra.gmra.mrb[20].mxu1 %vm126_vm1, %v2540_v55 }
0x153e   :  { %3770 = vmatpush3.bf16.msra.mxu1 %v4363_v3  ;;  %3603 = vmatprep.mubr.msk.f32.mxu1 %vm4149_vm0, %v4150_v1 }
0x153f   :  { %2805 = vrot.lane.b32.xlu0 %v2803_v57, %s4151_s24  ;;  %3777 = vmatprep.subr.bf16.mxu1 %v4148_v0 }
0x1579   :  { %v2616_v48 = vpop.permute.xlu1 %2615 }
0x157a   :  { %3604 = vmatmul.mubr.msk.f32.vlgmr.msra.gmra.mrb[20].mxu1 %vm126_vm1, %v2616_v48 }
0x157b   :  { %3779 = vmatpush3.bf16.msra.mxu1 %v4318_v32  ;;  %3625 = vmatprep.mubr.msk.f32.mxu1 %vm4149_vm0, %v4150_v1 }
0x157c   :  { %3780 = vmatprep.subr.bf16.mxu1 %v4148_v0  ;;  %v4704_v0 = vld [vmem:[%s4776_s8] sm:$0x1]  ;;  %s4157_s8 = smov [#allocation12]  }
0x157d   :  { %s3153_s27 = sshll.u32 %s4157_s8, 4  ;;  %s3154_s27 = int_to_ptr.vmem [resolvable:$true] %s3153_s27 }
0x157e   :  { %s4087_s29 = scalar_lea.vmem %s3154_s27, 128  ;;  %p4092_p13 = scmp.lt.s32.totalorder %s3154_s27, %s3154_s27 }
0x157f   :  { %3782 = vmatpush3.bf16.msra.mxu1 %v4321_v34  ;;  %p4088_p12 = scmp.ne.s32.totalorder %s3154_s27, %s4087_s29  ;;  %p4093_p0 = scmp.lt.s32.totalorder %s4087_s29, %s4087_s29 }
0x1581   :  { %p4094_p1 = por %p4093_p0, %p4092_p13 }
0x1583   :  { %p4095_p2 = pnand %p4094_p1, %p4088_p12 }
0x15b1   :  { %v2806_v50 = vpop.permute.xlu0 %2805 }
0x15b2   :  { %v2808_v58 = vadd.f32 %v2806_v50, %v2798_v51 }
0x15b4   :  { %3955 = vtanh.f32 %v2808_v58 }
0x15be   :  { %v3956_v60 = vpop.eup %3955 }
0x15bf   :  { %2811 = vrot.lane.b32.xlu1 %v3956_v60, %s4151_s24 }
0x1631   :  { %v2812_v62 = vpop.permute.xlu1 %2811 }
0x1632   :  { %v2814_v7 = vmul.f32 %v3954_v49, %v2812_v62 }
0x1634   :  { %v2816_v63 = vrot.slane %v2814_v7, 7 }
0x1636   :  { %2817 = vrot.lane.b32.xlu0 %v2816_v63, %s4152_s3 }
0x164d   :  { %v2685_v32 = vpop.f32.mrb[20].mxu1 }
0x164e   :  { %v3795_v34 = vadd.f32 %v4704_v0, %v2685_v32  ;;  %v3605_v6 = vpop.f32.mrb[21].mxu1 }
0x1650   :  { %3957 = vtanh.f32 %v3795_v34  ;;  %v3209_v11 = vmul.f32 -1.442695, %v3795_v34 }
0x1652   :  { %3959 = vpow2.f32 %v3209_v11 }
0x165a   :  { %v3958_v8 = vpop.eup %3957 }
0x165b   :  { %2699 = vrot.lane.b32.xlu1 %v3958_v8, %s4154_s21 }
0x165c   :  { %v3960_v61 = vpop.eup %3959 }
0x165d   :  { %v2693_v2 = vadd.f32 1.0, %v3960_v61 }
0x165f   :  { %3961 = vrcp.f32 %v2693_v2 }
0x1669   :  { %v3962_v4 = vpop.eup %3961 }
0x166a   :  { %v2697_v5 = vmul.f32 %v3962_v4, %v4664_v20  ;;  %v3087_v20 = vrot.slane %v4617_v36, 3 }
0x166c   :  { %v3104_v43 = vsel %vm3103_vm7, %v3102_v27, %v3087_v20 }
0x166d   :  { %v3106_v36 = vsel %vm3105_vm8, %v3104_v43, %v3090_v38 }
0x16a8   :  { %v2818_v9 = vpop.permute.xlu0 %2817 }
0x16a9   :  { %3626 = vmatmul.mubr.msk.f32.vlgmr.msra.gmra.mrb[22].mxu1 %vm200_vm2, %v2818_v9 }
0x16cd   :  { %v2700_v13 = vpop.permute.xlu1 %2699 }
0x16ce   :  { %v2702_v12 = vmul.f32 %v3962_v4, %v2700_v13 }
0x16d0   :  { %2704 = vrot.lane.b32.xlu0 %v2702_v12, %s4155_s0 }
0x1742   :  { %v2705_v15 = vpop.permute.xlu0 %2704 }
0x1743   :  { %v2707_v16 = vadd.f32 %v2705_v15, %v2697_v5 }
0x1745   :  { %3963 = vtanh.f32 %v2707_v16 }
0x174f   :  { %v3964_v17 = vpop.eup %3963 }
0x1750   :  { %2710 = vrot.lane.b32.xlu1 %v3964_v17, %s4155_s0 }
0x177c   :  { %v2887_v21 = vpop.f32.mrb[22].mxu1 }
0x177d   :  { %v2888_v31 = vadd.f32 %v4671_v23, %v2887_v21  ;;  %v3627_v25 = vpop.f32.mrb[23].mxu1 }
0x177f   :  { %v2891_v28 = vmax.f32 %v2888_v31, 0.0 }
0x1781   :  { %v2892_v35 = vmul.f32 0.5, %v2891_v28  ;;  %v3093_v22 = vrot.slane %v2891_v28, 1 }
0x1783   :  { %v2893_v40 = vmul.f32 1.442695, %v2892_v35  ;;  %v3108_v23 = vsel %vm3107_vm9, %v3106_v36, %v3093_v22 }
0x1784   :  { %3109 = vst.msk [vmem:[#allocation12] sm:$0xff] %vm200_vm2, %v3108_v23 }
0x1785   :  { %3965 = vpow2.f32 %v2893_v40 }
0x178f   :  { %v3966_v33 = vpop.eup %3965 }
0x1790   :  { %v2895_v24 = vmul.f32 1e-08, %v3966_v33 }
0x1792   :  { %2897 = vrot.lane.b32.xlu0 %v2895_v24, %s4153_s19 }
0x17c2   :  { %v2711_v41 = vpop.permute.xlu1 %2710 }
0x17c3   :  { %v2713_v30 = vmul.f32 %v3962_v4, %v2711_v41 }
0x17c5   :  { %v3120_v42 = vrot.slane %v2713_v30, 2  ;;  %2975 = vrot.lane.b32.xlu1 %v2713_v30, %s4156_s30 }
0x17c7   :  { %v3130_v44 = vsel %vm3105_vm8, %v4683_v46, %v3120_v42 }
0x1804   :  { %v2898_v45 = vpop.permute.xlu0 %2897 }
0x1805   :  { %v2900_v39 = vadd.f32 %v2898_v45, %v2891_v28 }
0x1807   :  { %3633 = vmatmul.mubr.msk.f32.vlgmr.msra.gmra.mrb[24].mxu0 %vm126_vm1, %v2900_v39 }
0x1808   :  { %3788 = vmatpush3.bf16.msra.mxu0 %v4363_v3  ;;  %3639 = vmatprep.mubr.msk.f32.mxu0 %vm4149_vm0, %v4150_v1 }
0x1837   :  { %v2976_v47 = vpop.permute.xlu1 %2975 }
0x1838   :  { %3640 = vmatmul.mubr.msk.f32.vlgmr.msra.gmra.mrb[24].mxu0 %vm126_vm1, %v2976_v47 }
0x190b   :  { %v3045_v14 = vpop.f32.mrb[24].mxu0 }
0x190c   :  { %v3796_v53 = vadd.f32 %v4704_v0, %v3045_v14  ;;  %v3641_v54 = vpop.f32.mrb[25].mxu0 }
0x190e   :  { %3967 = vtanh.f32 %v3796_v53  ;;  %v3215_v46 = vmul.f32 -1.442695, %v3796_v53 }
0x1910   :  { %3969 = vpow2.f32 %v3215_v46 }
0x1918   :  { %v3968_v55 = vpop.eup %3967 }
0x1919   :  { %3059 = vrot.lane.b32.xlu0 %v3968_v55, %s4154_s21 }
0x191a   :  { %v3970_v49 = vpop.eup %3969 }
0x191b   :  { %v3053_v56 = vadd.f32 1.0, %v3970_v49 }
0x191d   :  { %3971 = vrcp.f32 %v3053_v56 }
0x1927   :  { %v3972_v3 = vpop.eup %3971 }
0x1928   :  { %v3057_v1 = vmul.f32 %v3972_v3, %v2707_v16 }
0x198b   :  { %v3060_v57 = vpop.permute.xlu0 %3059 }
0x198c   :  { %v3062_v48 = vmul.f32 %v3972_v3, %v3060_v57 }
0x198e   :  { %3064 = vrot.lane.b32.xlu1 %v3062_v48, %s4155_s0 }
0x1a00   :  { %v3065_v59 = vpop.permute.xlu1 %3064 }
0x1a01   :  { %v3067_v51 = vadd.f32 %v3065_v59, %v3057_v1 }
0x1a03   :  { %3973 = vtanh.f32 %v3067_v51 }
0x1a0d   :  { %v3974_v50 = vpop.eup %3973 }
0x1a0e   :  { %3070 = vrot.lane.b32.xlu0 %v3974_v50, %s4155_s0 }
0x1a0f   :  { %4098 = shalt.err (!%p4095_p2)
}
0x1a10   :  { %s4099_s28 = scalar_lea.hbm %s4778_s10, 128 }
0x1a11   :  { %p4100_p3 = scmp.ne.s32.totalorder %s4778_s10, %s4099_s28  ;;  %p4103_p4 = scmp.lt.u32.totalorder %s4099_s28, %s4778_s10 }
0x1a13   :  { %p4105_p5 = pnand %p4103_p4, %p4100_p3 }
0x1a15   :  { %4108 = shalt.err (!%p4105_p5)
}
0x1a16   :  { %3156 = dma.vmem_to_hbm [thread:$0]  %s3154_s27, 128, %s4778_s10, [#allocation13]  }
0x1a17   :  { %s4158_s3 = smov [#allocation11]  }
0x1a18   :  { %s3143_s15 = sshll.u32 %s4158_s3, 4  ;;  %s3144_s15 = int_to_ptr.vmem [resolvable:$true] %s3143_s15 }
0x1a19   :  { %s4109_s16 = scalar_lea.vmem %s3144_s15, 128  ;;  %p4114_p7 = scmp.lt.s32.totalorder %s3144_s15, %s3144_s15 }
0x1a1a   :  { %p4110_p6 = scmp.ne.s32.totalorder %s3144_s15, %s4109_s16  ;;  %p4115_p8 = scmp.lt.s32.totalorder %s4109_s16, %s4109_s16 }
0x1a1c   :  { %p4116_p9 = por %p4115_p8, %p4114_p7 }
0x1a1e   :  { %p4117_p10 = pnand %p4116_p9, %p4110_p6 }
0x1a80   :  { %v3071_v58 = vpop.permute.xlu0 %3070 }
0x1a81   :  { %v3073_v60 = vmul.f32 %v3972_v3, %v3071_v58 }
0x1a83   :  { %v3123_v62 = vrot.slane %v3073_v60, 1 }
0x1a85   :  { %v3131_v7 = vsel %vm3107_vm9, %v3130_v44, %v3123_v62 }
0x1a86   :  { %3133 = vrot.lane.b32.xlu1 %v3131_v7, %s4156_s30 }
0x1af8   :  { %v3134_v63 = vpop.permute.xlu1 %3133 }
0x1af9   :  { %3136 = vst.msk [vmem:[#allocation11] sm:$0xff] %vm126_vm1, %v3134_v63 }
0x1afa   :  { %4120 = shalt.err (!%p4117_p10)
}
0x1afb   :  { %s4121_s18 = scalar_lea.hbm %s4777_s9, 128 }
0x1afc   :  { %p4122_p11 = scmp.ne.s32.totalorder %s4777_s9, %s4121_s18  ;;  %p4125_p12 = scmp.lt.u32.totalorder %s4121_s18, %s4777_s9 }
0x1afe   :  { %p4127_p13 = pnand %p4125_p12, %p4122_p11 }
0x1b00   :  { %4130 = shalt.err (!%p4127_p13)
}
0x1b01   :  { %3146 = dma.vmem_to_hbm [thread:$0]  %s3144_s15, 128, %s4777_s9, [#allocation4]  }
0x1b02   :  { %4137 = dma.done.wait [#allocation4], 128  }
0x1b03   :  { %4138 = vsyncadd [#allocation4], 4294967168 }
0x1b04   :  { %4139 = dma.done.wait [#allocation13], 128  }
0x1b05   :  { %4140 = vsyncadd [#allocation13], 4294967168 }
0x1b06   :  { %3163 = vsyncpa [#allocation3], 1 }
0x1b07   :  { %3164 = vsyncpa [#allocation6], 1 }
0x1b08   :  { %3165 = vsyncpa [#allocation9], 1 }
0x1b09   :  { %3166 = vsyncpa [#allocation4], 1 }
0x1b0a   :  { %3167 = vsyncpa [#allocation13], 1 }

</bundles_post_ra>
